<compile_context>
chip_gen: v5e
topology: v5e:2x2
jax: 0.10.0
libtpu: 0.0.40
codegen_flags: <defaults>
</compile_context>

<pallas_src>
import functools

import jax
import jax.numpy as jnp
from jax import lax
from jax.experimental import pallas as pl
from jax.experimental.pallas import tpu as pltpu


# ------------------------------ Pallas kernel ------------------------------ #

def _cross_attn_kernel(x_ref, y_ref, wq_ref, bq_ref, wkv_ref, bkv_ref,
                       wproj_ref, bproj_ref, o_ref,
                       q_scr, m_scr, l_scr, acc_scr,
                       *, num_heads, scale):
    """One grid step = (batch b, q tile qi, key tile ki)."""
    C = x_ref.shape[-1]
    hd = C // num_heads
    ki = pl.program_id(2)
    nk = pl.num_programs(2)

    # Contract the last ("in") axis of both operands: a @ W.T with no
    # transpose (weights keep the PyTorch (out, in) layout).
    ck = (((1,), (1,)), ((), ()))

    # -- per-(batch, q-tile) init: scaled q projection + online-softmax state --
    @pl.when(ki == 0)
    def _():
        x = x_ref[0]                                              # (tq, C) bf16
        q = (lax.dot_general(x, wq_ref[...], ck,
                             preferred_element_type=jnp.float32)
             + bq_ref[...]) * scale                               # f32
        q_scr[...] = q.astype(q_scr.dtype)                        # bf16
        m_scr[...] = jnp.full(m_scr.shape, -jnp.inf, dtype=m_scr.dtype)
        l_scr[...] = jnp.zeros(l_scr.shape, dtype=l_scr.dtype)
        acc_scr[...] = jnp.zeros(acc_scr.shape, dtype=acc_scr.dtype)

    # -- kv projection of the current key/value tile only --
    y = y_ref[0]                                                  # (tk, C) bf16
    kv = (lax.dot_general(y, wkv_ref[...], ck,
                          preferred_element_type=jnp.float32)
          + bkv_ref[...])                                         # (tk, 2C) f32
    k_all = kv[:, :C].astype(jnp.bfloat16)                        # (tk, C)
    v_all = kv[:, C:].astype(jnp.bfloat16)                        # (tk, C)

    # -- online softmax, one head at a time; state lives in VMEM scratch so
    #    each head's (tq, tk) score tile dies before the next head starts --
    for h in range(num_heads):
        cols = slice(h * hd, (h + 1) * hd)
        s = lax.dot_general(q_scr[:, cols], k_all[:, cols], ck,
                            preferred_element_type=jnp.float32)   # (tq, tk) f32
        m_prev = m_scr[h]                                         # (tq, 1) f32
        m_new = jnp.maximum(m_prev, jnp.max(s, axis=-1, keepdims=True))
        alpha = jnp.exp(m_prev - m_new)                           # f32
        p = jnp.exp(s - m_new)                                    # f32
        l_scr[h] = alpha * l_scr[h] + jnp.sum(p, axis=-1, keepdims=True)
        pv = jnp.dot(p.astype(jnp.bfloat16), v_all[:, cols],
                     preferred_element_type=jnp.float32)          # (tq, hd) f32
        acc_scr[:, cols] = alpha * acc_scr[:, cols] + pv
        m_scr[h] = m_new

    # -- finalize: normalize (after PV), heads are already merged in the
    #    (tq, C) scratch slab, then apply the output projection --
    @pl.when(ki == nk - 1)
    def _():
        for h in range(num_heads):
            cols = slice(h * hd, (h + 1) * hd)
            inv_l = pl.reciprocal(l_scr[h], approx=True)          # (tq, 1)
            acc_scr[:, cols] = acc_scr[:, cols] * inv_l
        o = acc_scr[...].astype(jnp.bfloat16)                     # (tq, C)
        out = (lax.dot_general(o, wproj_ref[...], ck,
                               preferred_element_type=jnp.float32)
               + bproj_ref[...])
        o_ref[0] = out.astype(o_ref.dtype)


# --------------------------------- wrapper ---------------------------------- #

def cross_attention(x, y, params, num_heads, *, tq=None, tk=None):
    """Pallas implementation of CrossAttention.forward (dropout p = 0)."""
    B, Nx, C = x.shape
    _, Ny, _ = y.shape
    assert C % num_heads == 0, "dim must be divisible by num_heads"
    head_dim = C // num_heads
    scale = head_dim ** (-0.5)

    tq = min(Nx, 128) if tq is None else tq
    tk = min(Ny, 128) if tk is None else tk
    assert Nx % tq == 0 and Ny % tk == 0
    n_q, n_k = Nx // tq, Ny // tk

    out_dtype = x.dtype

    # Feed the MXU bf16; f32 accumulation comes from preferred_element_type.
    xb = x.astype(jnp.bfloat16)
    yb = y.astype(jnp.bfloat16)
    wq = params["wq"].astype(jnp.bfloat16)
    wkv = params["wkv"].astype(jnp.bfloat16)
    wproj = params["wproj"].astype(jnp.bfloat16)
    bq = params["bq"].reshape(1, C).astype(jnp.float32)
    bkv = params["bkv"].reshape(1, 2 * C).astype(jnp.float32)
    bproj = params["bproj"].reshape(1, C).astype(jnp.float32)

    kern = functools.partial(_cross_attn_kernel,
                             num_heads=num_heads, scale=scale)

    def full_spec(shape):
        # Whole array resident across the grid (constant block index -> the
        # pipeline only fetches it once).
        return pl.BlockSpec(shape, lambda b, qi, ki: (0,) * len(shape))

    return pl.pallas_call(
        kern,
        out_shape=jax.ShapeDtypeStruct((B, Nx, C), out_dtype),
        grid=(B, n_q, n_k),
        in_specs=[
            pl.BlockSpec((1, tq, C), lambda b, qi, ki: (b, qi, 0)),   # x
            pl.BlockSpec((1, tk, C), lambda b, qi, ki: (b, ki, 0)),   # y
            full_spec(wq.shape), full_spec(bq.shape),
            full_spec(wkv.shape), full_spec(bkv.shape),
            full_spec(wproj.shape), full_spec(bproj.shape),
        ],
        out_specs=pl.BlockSpec((1, tq, C), lambda b, qi, ki: (b, qi, 0)),
        scratch_shapes=[
            pltpu.VMEM((tq, C), jnp.bfloat16),             # scaled q projection
            pltpu.VMEM((num_heads, tq, 1), jnp.float32),   # running max m
            pltpu.VMEM((num_heads, tq, 1), jnp.float32),   # running sum l
            pltpu.VMEM((tq, C), jnp.float32),              # acc / merged heads
        ],
        compiler_params=pltpu.CompilerParams(
            dimension_semantics=("parallel", "arbitrary", "arbitrary")),
    )(xb, yb, wq, bq, wkv, bkv, wproj, bproj)


# --------------------------- reference (plain JAX) -------------------------- #

def cross_attention_ref(x, y, params, num_heads):
    B, Nx, C = x.shape
    _, Ny, _ = y.shape
    hd = C // num_heads
    scale = hd ** (-0.5)
    q = (x @ params["wq"].T + params["bq"]).reshape(B, Nx, num_heads, hd).transpose(0, 2, 1, 3)
    kv = (y @ params["wkv"].T + params["bkv"]).reshape(B, Ny, 2, num_heads, hd)
    k = kv[:, :, 0].transpose(0, 2, 1, 3)
    v = kv[:, :, 1].transpose(0, 2, 1, 3)
    attn = jnp.einsum("bhqd,bhkd->bhqk", q, k) * scale
    attn = jax.nn.softmax(attn, axis=-1)
    o = jnp.einsum("bhqk,bhkd->bhqd", attn, v).transpose(0, 2, 1, 3).reshape(B, Nx, C)
    return o @ params["wproj"].T + params["bproj"]


# ----------------------------------- main ----------------------------------- #

if __name__ == "__main__":
    B, Nx, Ny, dim, num_heads = 2, 8, 8, 32, 8  # head_dim = 4

    key = jax.random.PRNGKey(0)
    kx, ky, k1, k2, k3, k4 = jax.random.split(key, 6)

    x = jax.random.normal(kx, (B, Nx, dim), dtype=jnp.float32)
    y = jax.random.normal(ky, (B, Ny, dim), dtype=jnp.float32)

    # qkv_bias=False -> zero q/kv biases (identical result); proj has a bias.
    params = {
        "wq": jax.random.normal(k1, (dim, dim), dtype=jnp.float32) * 0.05,
        "bq": jnp.zeros((dim,), dtype=jnp.float32),
        "wkv": jax.random.normal(k2, (2 * dim, dim), dtype=jnp.float32) * 0.05,
        "bkv": jnp.zeros((2 * dim,), dtype=jnp.float32),
        "wproj": jax.random.normal(k3, (dim, dim), dtype=jnp.float32) * 0.05,
        "bproj": jax.random.normal(k4, (dim,), dtype=jnp.float32) * 0.05,
    }

    out = jax.block_until_ready(cross_attention(x, y, params, num_heads))
    ref = cross_attention_ref(x, y, params, num_heads)

    assert out.shape == (B, Nx, dim)
    # Tolerance relaxed for bf16 MXU inputs and pl.reciprocal(approx=True);
    # the f32 reference is the gold value.
    assert jnp.allclose(out, ref, atol=2e-2, rtol=2e-2), "mismatch vs reference"

    print("KERNEL_OK")
</pallas_src>

<mosaic_0001>
module attributes {stable_mosaic.version = 11 : i64} {
  func.func @_cross_attn_kernel(%arg0: i32, %arg1: i32, %arg2: i32, %arg3: memref<1x8x32xbf16, #tpu.memory_space<vmem>>, %arg4: memref<1x8x32xbf16, #tpu.memory_space<vmem>>, %arg5: memref<32x32xbf16, #tpu.memory_space<vmem>>, %arg6: memref<1x32xf32, #tpu.memory_space<vmem>>, %arg7: memref<64x32xbf16, #tpu.memory_space<vmem>>, %arg8: memref<1x64xf32, #tpu.memory_space<vmem>>, %arg9: memref<32x32xbf16, #tpu.memory_space<vmem>>, %arg10: memref<1x32xf32, #tpu.memory_space<vmem>>, %arg11: memref<1x8x32xf32, #tpu.memory_space<vmem>>, %arg12: memref<8x32xbf16, #tpu.memory_space<vmem>>, %arg13: memref<8x8x1xf32, #tpu.memory_space<vmem>>, %arg14: memref<8x8x1xf32, #tpu.memory_space<vmem>>, %arg15: memref<8x32xf32, #tpu.memory_space<vmem>>) attributes {dimension_semantics = [#tpu.dimension_semantics<parallel>, #tpu.dimension_semantics<arbitrary>, #tpu.dimension_semantics<arbitrary>], iteration_bounds = array<i64: 2, 1, 1>, scalar_prefetch = 0 : i64, scratch_operands = 4 : i64, tpu.core_type = #tpu.core_type<tc>, window_params = [{transform_indices = @transform_0, window_bounds = array<i64: 1, 8, 32>}, {transform_indices = @transform_1, window_bounds = array<i64: 1, 8, 32>}, {pipeline_mode = #tpu.pipeline_mode<synchronous>, transform_indices = @transform_2, window_bounds = array<i64: 32, 32>}, {pipeline_mode = #tpu.pipeline_mode<synchronous>, transform_indices = @transform_3, window_bounds = array<i64: 1, 32>}, {pipeline_mode = #tpu.pipeline_mode<synchronous>, transform_indices = @transform_4, window_bounds = array<i64: 64, 32>}, {pipeline_mode = #tpu.pipeline_mode<synchronous>, transform_indices = @transform_5, window_bounds = array<i64: 1, 64>}, {pipeline_mode = #tpu.pipeline_mode<synchronous>, transform_indices = @transform_6, window_bounds = array<i64: 32, 32>}, {pipeline_mode = #tpu.pipeline_mode<synchronous>, transform_indices = @transform_7, window_bounds = array<i64: 1, 32>}, {transform_indices = @transform_8, window_bounds = array<i64: 1, 8, 32>}]} {
    %c0_i32 = arith.constant 0 : i32
    %0 = arith.cmpi eq, %arg2, %c0_i32 : i32
    %1 = arith.extui %0 : i1 to i32
    %c0_i32_0 = arith.constant 0 : i32
    %2 = arith.cmpi ne, %1, %c0_i32_0 : i32
    scf.if %2 {
      %c0_172 = arith.constant 0 : index
      %c0_173 = arith.constant 0 : index
      %c0_174 = arith.constant 0 : index
      %281 = vector.load %arg3[%c0_172, %c0_173, %c0_174] : memref<1x8x32xbf16, #tpu.memory_space<vmem>>, vector<1x8x32xbf16>
      %282 = vector.shape_cast %281 : vector<1x8x32xbf16> to vector<8x32xbf16>
      %c0_175 = arith.constant 0 : index
      %c0_176 = arith.constant 0 : index
      %283 = vector.load %arg5[%c0_175, %c0_176] : memref<32x32xbf16, #tpu.memory_space<vmem>>, vector<32x32xbf16>
      %cst_177 = arith.constant dense<0.000000e+00> : vector<8x32xf32>
      %284 = tpu.matmul %282, %283, %cst_177 {dimension_numbers = #tpu.dot_dimension_numbers<[1], [1], [0], [0], [0, 0, 1, 0], [], []>} : vector<8x32xbf16>, vector<32x32xbf16>, vector<8x32xf32> -> vector<8x32xf32>
      %c0_178 = arith.constant 0 : index
      %c0_179 = arith.constant 0 : index
      %285 = vector.load %arg6[%c0_178, %c0_179] : memref<1x32xf32, #tpu.memory_space<vmem>>, vector<1x32xf32>
      %286 = vector.broadcast %285 : vector<1x32xf32> to vector<8x32xf32>
      %287 = arith.addf %284, %286 : vector<8x32xf32>
      %cst_180 = arith.constant 5.000000e-01 : f32
      %288 = vector.broadcast %cst_180 : f32 to vector<8x32xf32>
      %289 = arith.mulf %287, %288 : vector<8x32xf32>
      %290 = arith.truncf %289 : vector<8x32xf32> to vector<8x32xbf16>
      %c0_181 = arith.constant 0 : index
      %c0_182 = arith.constant 0 : index
      %291 = vector.load %arg12[%c0_181, %c0_182] : memref<8x32xbf16, #tpu.memory_space<vmem>>, vector<8x32xbf16>
      tpu.vector_store %arg12[%c0_181, %c0_182], %290 {strides = array<i32>} : memref<8x32xbf16, #tpu.memory_space<vmem>>, vector<8x32xbf16>,
      %cst_183 = arith.constant 0xFF800000 : f32
      %292 = vector.broadcast %cst_183 : f32 to vector<8x8x1xf32>
      %c0_184 = arith.constant 0 : index
      %c0_185 = arith.constant 0 : index
      %c0_186 = arith.constant 0 : index
      %293 = vector.load %arg13[%c0_184, %c0_185, %c0_186] : memref<8x8x1xf32, #tpu.memory_space<vmem>>, vector<8x8x1xf32>
      tpu.vector_store %arg13[%c0_184, %c0_185, %c0_186], %292 {strides = array<i32>} : memref<8x8x1xf32, #tpu.memory_space<vmem>>, vector<8x8x1xf32>,
      %cst_187 = arith.constant 0.000000e+00 : f32
      %294 = vector.broadcast %cst_187 : f32 to vector<8x8x1xf32>
      %c0_188 = arith.constant 0 : index
      %c0_189 = arith.constant 0 : index
      %c0_190 = arith.constant 0 : index
      %295 = vector.load %arg14[%c0_188, %c0_189, %c0_190] : memref<8x8x1xf32, #tpu.memory_space<vmem>>, vector<8x8x1xf32>
      tpu.vector_store %arg14[%c0_188, %c0_189, %c0_190], %294 {strides = array<i32>} : memref<8x8x1xf32, #tpu.memory_space<vmem>>, vector<8x8x1xf32>,
      %cst_191 = arith.constant 0.000000e+00 : f32
      %296 = vector.broadcast %cst_191 : f32 to vector<8x32xf32>
      %c0_192 = arith.constant 0 : index
      %c0_193 = arith.constant 0 : index
      %297 = vector.load %arg15[%c0_192, %c0_193] : memref<8x32xf32, #tpu.memory_space<vmem>>, vector<8x32xf32>
      tpu.vector_store %arg15[%c0_192, %c0_193], %296 {strides = array<i32>} : memref<8x32xf32, #tpu.memory_space<vmem>>, vector<8x32xf32>,
    } else {
    }
    %c0 = arith.constant 0 : index
    %c0_1 = arith.constant 0 : index
    %c0_2 = arith.constant 0 : index
    %3 = vector.load %arg4[%c0, %c0_1, %c0_2] : memref<1x8x32xbf16, #tpu.memory_space<vmem>>, vector<1x8x32xbf16>
    %4 = vector.shape_cast %3 : vector<1x8x32xbf16> to vector<8x32xbf16>
    %c0_3 = arith.constant 0 : index
    %c0_4 = arith.constant 0 : index
    %5 = vector.load %arg7[%c0_3, %c0_4] : memref<64x32xbf16, #tpu.memory_space<vmem>>, vector<64x32xbf16>
    %cst = arith.constant dense<0.000000e+00> : vector<8x64xf32>
    %6 = tpu.matmul %4, %5, %cst {dimension_numbers = #tpu.dot_dimension_numbers<[1], [1], [0], [0], [0, 0, 1, 0], [], []>} : vector<8x32xbf16>, vector<64x32xbf16>, vector<8x64xf32> -> vector<8x64xf32>
    %c0_5 = arith.constant 0 : index
    %c0_6 = arith.constant 0 : index
    %7 = vector.load %arg8[%c0_5, %c0_6] : memref<1x64xf32, #tpu.memory_space<vmem>>, vector<1x64xf32>
    %8 = vector.broadcast %7 : vector<1x64xf32> to vector<8x64xf32>
    %9 = arith.addf %6, %8 : vector<8x64xf32>
    %10 = vector.extract_strided_slice %9 {offsets = [0, 0], sizes = [8, 32], strides = [1, 1]} : vector<8x64xf32> to vector<8x32xf32>
    %11 = arith.truncf %10 : vector<8x32xf32> to vector<8x32xbf16>
    %12 = vector.extract_strided_slice %9 {offsets = [0, 32], sizes = [8, 32], strides = [1, 1]} : vector<8x64xf32> to vector<8x32xf32>
    %13 = arith.truncf %12 : vector<8x32xf32> to vector<8x32xbf16>
    %c0_7 = arith.constant 0 : index
    %c0_8 = arith.constant 0 : index
    %14 = vector.load %arg12[%c0_7, %c0_8] : memref<8x32xbf16, #tpu.memory_space<vmem>>, vector<8x4xbf16>
    %15 = vector.extract_strided_slice %11 {offsets = [0, 0], sizes = [8, 4], strides = [1, 1]} : vector<8x32xbf16> to vector<8x4xbf16>
    %cst_9 = arith.constant dense<0.000000e+00> : vector<8x8xf32>
    %16 = tpu.matmul %14, %15, %cst_9 {dimension_numbers = #tpu.dot_dimension_numbers<[1], [1], [0], [0], [0, 0, 1, 0], [], []>} : vector<8x4xbf16>, vector<8x4xbf16>, vector<8x8xf32> -> vector<8x8xf32>
    %c0_10 = arith.constant 0 : index
    %c0_11 = arith.constant 0 : index
    %c0_12 = arith.constant 0 : index
    %17 = vector.load %arg13[%c0_10, %c0_11, %c0_12] : memref<8x8x1xf32, #tpu.memory_space<vmem>>, vector<1x8x1xf32>
    %18 = vector.shape_cast %17 : vector<1x8x1xf32> to vector<8x1xf32>
    %cst_13 = arith.constant dense<0xFF800000> : vector<8xf32>
    %19 = vector.multi_reduction <maximumf>, %16, %cst_13 [1] : vector<8x8xf32> to vector<8xf32>
    %20 = vector.shape_cast %19 : vector<8xf32> to vector<8x1xf32>
    %21 = arith.maximumf %18, %20 : vector<8x1xf32>
    %22 = arith.subf %18, %21 : vector<8x1xf32>
    %23 = math.exp %22 : vector<8x1xf32>
    %24 = vector.broadcast %21 : vector<8x1xf32> to vector<8x8xf32>
    %25 = arith.subf %16, %24 : vector<8x8xf32>
    %26 = math.exp %25 : vector<8x8xf32>
    %c0_14 = arith.constant 0 : index
    %c0_15 = arith.constant 0 : index
    %c0_16 = arith.constant 0 : index
    %27 = vector.load %arg14[%c0_14, %c0_15, %c0_16] : memref<8x8x1xf32, #tpu.memory_space<vmem>>, vector<1x8x1xf32>
    %28 = vector.shape_cast %27 : vector<1x8x1xf32> to vector<8x1xf32>
    %29 = arith.mulf %23, %28 : vector<8x1xf32>
    %cst_17 = arith.constant dense<0.000000e+00> : vector<8xf32>
    %30 = vector.multi_reduction <add>, %26, %cst_17 [1] : vector<8x8xf32> to vector<8xf32>
    %31 = vector.shape_cast %30 : vector<8xf32> to vector<8x1xf32>
    %32 = arith.addf %29, %31 : vector<8x1xf32>
    %c0_18 = arith.constant 0 : index
    %c0_19 = arith.constant 0 : index
    %c0_20 = arith.constant 0 : index
    %33 = vector.load %arg14[%c0_18, %c0_19, %c0_20] : memref<8x8x1xf32, #tpu.memory_space<vmem>>, vector<1x8x1xf32>
    %34 = vector.shape_cast %33 : vector<1x8x1xf32> to vector<8x1xf32>
    %35 = vector.shape_cast %32 : vector<8x1xf32> to vector<1x8x1xf32>
    tpu.vector_store %arg14[%c0_18, %c0_19, %c0_20], %35 {strides = array<i32>} : memref<8x8x1xf32, #tpu.memory_space<vmem>>, vector<1x8x1xf32>,
    %36 = arith.truncf %26 : vector<8x8xf32> to vector<8x8xbf16>
    %37 = vector.extract_strided_slice %13 {offsets = [0, 0], sizes = [8, 4], strides = [1, 1]} : vector<8x32xbf16> to vector<8x4xbf16>
    %cst_21 = arith.constant dense<0.000000e+00> : vector<8x4xf32>
    %38 = tpu.matmul %36, %37, %cst_21 {dimension_numbers = #tpu.dot_dimension_numbers<[1], [0], [0], [1], [0, 0, 1, 1], [], []>} : vector<8x8xbf16>, vector<8x4xbf16>, vector<8x4xf32> -> vector<8x4xf32>
    %c0_22 = arith.constant 0 : index
    %c0_23 = arith.constant 0 : index
    %39 = vector.load %arg15[%c0_22, %c0_23] : memref<8x32xf32, #tpu.memory_space<vmem>>, vector<8x4xf32>
    %40 = vector.broadcast %23 : vector<8x1xf32> to vector<8x4xf32>
    %41 = arith.mulf %40, %39 : vector<8x4xf32>
    %42 = arith.addf %41, %38 : vector<8x4xf32>
    %c0_24 = arith.constant 0 : index
    %c0_25 = arith.constant 0 : index
    %43 = vector.load %arg15[%c0_24, %c0_25] : memref<8x32xf32, #tpu.memory_space<vmem>>, vector<8x4xf32>
    tpu.vector_store %arg15[%c0_24, %c0_25], %42 {strides = array<i32>} : memref<8x32xf32, #tpu.memory_space<vmem>>, vector<8x4xf32>,
    %c0_26 = arith.constant 0 : index
    %c0_27 = arith.constant 0 : index
    %c0_28 = arith.constant 0 : index
    %44 = vector.load %arg13[%c0_26, %c0_27, %c0_28] : memref<8x8x1xf32, #tpu.memory_space<vmem>>, vector<1x8x1xf32>
    %45 = vector.shape_cast %44 : vector<1x8x1xf32> to vector<8x1xf32>
    %46 = vector.shape_cast %21 : vector<8x1xf32> to vector<1x8x1xf32>
    tpu.vector_store %arg13[%c0_26, %c0_27, %c0_28], %46 {strides = array<i32>} : memref<8x8x1xf32, #tpu.memory_space<vmem>>, vector<1x8x1xf32>,
    %c0_29 = arith.constant 0 : index
    %c4 = arith.constant 4 : index
    %47 = vector.load %arg12[%c0_29, %c4] : memref<8x32xbf16, #tpu.memory_space<vmem>>, vector<8x4xbf16>
    %48 = vector.extract_strided_slice %11 {offsets = [0, 4], sizes = [8, 4], strides = [1, 1]} : vector<8x32xbf16> to vector<8x4xbf16>
    %cst_30 = arith.constant dense<0.000000e+00> : vector<8x8xf32>
    %49 = tpu.matmul %47, %48, %cst_30 {dimension_numbers = #tpu.dot_dimension_numbers<[1], [1], [0], [0], [0, 0, 1, 0], [], []>} : vector<8x4xbf16>, vector<8x4xbf16>, vector<8x8xf32> -> vector<8x8xf32>
    %c1 = arith.constant 1 : index
    %c0_31 = arith.constant 0 : index
    %c0_32 = arith.constant 0 : index
    %50 = vector.load %arg13[%c1, %c0_31, %c0_32] : memref<8x8x1xf32, #tpu.memory_space<vmem>>, vector<1x8x1xf32>
    %51 = vector.shape_cast %50 : vector<1x8x1xf32> to vector<8x1xf32>
    %cst_33 = arith.constant dense<0xFF800000> : vector<8xf32>
    %52 = vector.multi_reduction <maximumf>, %49, %cst_33 [1] : vector<8x8xf32> to vector<8xf32>
    %53 = vector.shape_cast %52 : vector<8xf32> to vector<8x1xf32>
    %54 = arith.maximumf %51, %53 : vector<8x1xf32>
    %55 = arith.subf %51, %54 : vector<8x1xf32>
    %56 = math.exp %55 : vector<8x1xf32>
    %57 = vector.broadcast %54 : vector<8x1xf32> to vector<8x8xf32>
    %58 = arith.subf %49, %57 : vector<8x8xf32>
    %59 = math.exp %58 : vector<8x8xf32>
    %c1_34 = arith.constant 1 : index
    %c0_35 = arith.constant 0 : index
    %c0_36 = arith.constant 0 : index
    %60 = vector.load %arg14[%c1_34, %c0_35, %c0_36] : memref<8x8x1xf32, #tpu.memory_space<vmem>>, vector<1x8x1xf32>
    %61 = vector.shape_cast %60 : vector<1x8x1xf32> to vector<8x1xf32>
    %62 = arith.mulf %56, %61 : vector<8x1xf32>
    %cst_37 = arith.constant dense<0.000000e+00> : vector<8xf32>
    %63 = vector.multi_reduction <add>, %59, %cst_37 [1] : vector<8x8xf32> to vector<8xf32>
    %64 = vector.shape_cast %63 : vector<8xf32> to vector<8x1xf32>
    %65 = arith.addf %62, %64 : vector<8x1xf32>
    %c1_38 = arith.constant 1 : index
    %c0_39 = arith.constant 0 : index
    %c0_40 = arith.constant 0 : index
    %66 = vector.load %arg14[%c1_38, %c0_39, %c0_40] : memref<8x8x1xf32, #tpu.memory_space<vmem>>, vector<1x8x1xf32>
    %67 = vector.shape_cast %66 : vector<1x8x1xf32> to vector<8x1xf32>
    %68 = vector.shape_cast %65 : vector<8x1xf32> to vector<1x8x1xf32>
    tpu.vector_store %arg14[%c1_38, %c0_39, %c0_40], %68 {strides = array<i32>} : memref<8x8x1xf32, #tpu.memory_space<vmem>>, vector<1x8x1xf32>,
    %69 = arith.truncf %59 : vector<8x8xf32> to vector<8x8xbf16>
    %70 = vector.extract_strided_slice %13 {offsets = [0, 4], sizes = [8, 4], strides = [1, 1]} : vector<8x32xbf16> to vector<8x4xbf16>
    %cst_41 = arith.constant dense<0.000000e+00> : vector<8x4xf32>
    %71 = tpu.matmul %69, %70, %cst_41 {dimension_numbers = #tpu.dot_dimension_numbers<[1], [0], [0], [1], [0, 0, 1, 1], [], []>} : vector<8x8xbf16>, vector<8x4xbf16>, vector<8x4xf32> -> vector<8x4xf32>
    %c0_42 = arith.constant 0 : index
    %c4_43 = arith.constant 4 : index
    %72 = vector.load %arg15[%c0_42, %c4_43] : memref<8x32xf32, #tpu.memory_space<vmem>>, vector<8x4xf32>
    %73 = vector.broadcast %56 : vector<8x1xf32> to vector<8x4xf32>
    %74 = arith.mulf %73, %72 : vector<8x4xf32>
    %75 = arith.addf %74, %71 : vector<8x4xf32>
    %c0_44 = arith.constant 0 : index
    %c4_45 = arith.constant 4 : index
    %76 = vector.load %arg15[%c0_44, %c4_45] : memref<8x32xf32, #tpu.memory_space<vmem>>, vector<8x4xf32>
    tpu.vector_store %arg15[%c0_44, %c4_45], %75 {strides = array<i32>} : memref<8x32xf32, #tpu.memory_space<vmem>>, vector<8x4xf32>,
    %c1_46 = arith.constant 1 : index
    %c0_47 = arith.constant 0 : index
    %c0_48 = arith.constant 0 : index
    %77 = vector.load %arg13[%c1_46, %c0_47, %c0_48] : memref<8x8x1xf32, #tpu.memory_space<vmem>>, vector<1x8x1xf32>
    %78 = vector.shape_cast %77 : vector<1x8x1xf32> to vector<8x1xf32>
    %79 = vector.shape_cast %54 : vector<8x1xf32> to vector<1x8x1xf32>
    tpu.vector_store %arg13[%c1_46, %c0_47, %c0_48], %79 {strides = array<i32>} : memref<8x8x1xf32, #tpu.memory_space<vmem>>, vector<1x8x1xf32>,
    %c0_49 = arith.constant 0 : index
    %c8 = arith.constant 8 : index
    %80 = vector.load %arg12[%c0_49, %c8] : memref<8x32xbf16, #tpu.memory_space<vmem>>, vector<8x4xbf16>
    %81 = vector.extract_strided_slice %11 {offsets = [0, 8], sizes = [8, 4], strides = [1, 1]} : vector<8x32xbf16> to vector<8x4xbf16>
    %cst_50 = arith.constant dense<0.000000e+00> : vector<8x8xf32>
    %82 = tpu.matmul %80, %81, %cst_50 {dimension_numbers = #tpu.dot_dimension_numbers<[1], [1], [0], [0], [0, 0, 1, 0], [], []>} : vector<8x4xbf16>, vector<8x4xbf16>, vector<8x8xf32> -> vector<8x8xf32>
    %c2 = arith.constant 2 : index
    %c0_51 = arith.constant 0 : index
    %c0_52 = arith.constant 0 : index
    %83 = vector.load %arg13[%c2, %c0_51, %c0_52] : memref<8x8x1xf32, #tpu.memory_space<vmem>>, vector<1x8x1xf32>
    %84 = vector.shape_cast %83 : vector<1x8x1xf32> to vector<8x1xf32>
    %cst_53 = arith.constant dense<0xFF800000> : vector<8xf32>
    %85 = vector.multi_reduction <maximumf>, %82, %cst_53 [1] : vector<8x8xf32> to vector<8xf32>
    %86 = vector.shape_cast %85 : vector<8xf32> to vector<8x1xf32>
    %87 = arith.maximumf %84, %86 : vector<8x1xf32>
    %88 = arith.subf %84, %87 : vector<8x1xf32>
    %89 = math.exp %88 : vector<8x1xf32>
    %90 = vector.broadcast %87 : vector<8x1xf32> to vector<8x8xf32>
    %91 = arith.subf %82, %90 : vector<8x8xf32>
    %92 = math.exp %91 : vector<8x8xf32>
    %c2_54 = arith.constant 2 : index
    %c0_55 = arith.constant 0 : index
    %c0_56 = arith.constant 0 : index
    %93 = vector.load %arg14[%c2_54, %c0_55, %c0_56] : memref<8x8x1xf32, #tpu.memory_space<vmem>>, vector<1x8x1xf32>
    %94 = vector.shape_cast %93 : vector<1x8x1xf32> to vector<8x1xf32>
    %95 = arith.mulf %89, %94 : vector<8x1xf32>
    %cst_57 = arith.constant dense<0.000000e+00> : vector<8xf32>
    %96 = vector.multi_reduction <add>, %92, %cst_57 [1] : vector<8x8xf32> to vector<8xf32>
    %97 = vector.shape_cast %96 : vector<8xf32> to vector<8x1xf32>
    %98 = arith.addf %95, %97 : vector<8x1xf32>
    %c2_58 = arith.constant 2 : index
    %c0_59 = arith.constant 0 : index
    %c0_60 = arith.constant 0 : index
    %99 = vector.load %arg14[%c2_58, %c0_59, %c0_60] : memref<8x8x1xf32, #tpu.memory_space<vmem>>, vector<1x8x1xf32>
    %100 = vector.shape_cast %99 : vector<1x8x1xf32> to vector<8x1xf32>
    %101 = vector.shape_cast %98 : vector<8x1xf32> to vector<1x8x1xf32>
    tpu.vector_store %arg14[%c2_58, %c0_59, %c0_60], %101 {strides = array<i32>} : memref<8x8x1xf32, #tpu.memory_space<vmem>>, vector<1x8x1xf32>,
    %102 = arith.truncf %92 : vector<8x8xf32> to vector<8x8xbf16>
    %103 = vector.extract_strided_slice %13 {offsets = [0, 8], sizes = [8, 4], strides = [1, 1]} : vector<8x32xbf16> to vector<8x4xbf16>
    %cst_61 = arith.constant dense<0.000000e+00> : vector<8x4xf32>
    %104 = tpu.matmul %102, %103, %cst_61 {dimension_numbers = #tpu.dot_dimension_numbers<[1], [0], [0], [1], [0, 0, 1, 1], [], []>} : vector<8x8xbf16>, vector<8x4xbf16>, vector<8x4xf32> -> vector<8x4xf32>
    %c0_62 = arith.constant 0 : index
    %c8_63 = arith.constant 8 : index
    %105 = vector.load %arg15[%c0_62, %c8_63] : memref<8x32xf32, #tpu.memory_space<vmem>>, vector<8x4xf32>
    %106 = vector.broadcast %89 : vector<8x1xf32> to vector<8x4xf32>
    %107 = arith.mulf %106, %105 : vector<8x4xf32>
    %108 = arith.addf %107, %104 : vector<8x4xf32>
    %c0_64 = arith.constant 0 : index
    %c8_65 = arith.constant 8 : index
    %109 = vector.load %arg15[%c0_64, %c8_65] : memref<8x32xf32, #tpu.memory_space<vmem>>, vector<8x4xf32>
    tpu.vector_store %arg15[%c0_64, %c8_65], %108 {strides = array<i32>} : memref<8x32xf32, #tpu.memory_space<vmem>>, vector<8x4xf32>,
    %c2_66 = arith.constant 2 : index
    %c0_67 = arith.constant 0 : index
    %c0_68 = arith.constant 0 : index
    %110 = vector.load %arg13[%c2_66, %c0_67, %c0_68] : memref<8x8x1xf32, #tpu.memory_space<vmem>>, vector<1x8x1xf32>
    %111 = vector.shape_cast %110 : vector<1x8x1xf32> to vector<8x1xf32>
    %112 = vector.shape_cast %87 : vector<8x1xf32> to vector<1x8x1xf32>
    tpu.vector_store %arg13[%c2_66, %c0_67, %c0_68], %112 {strides = array<i32>} : memref<8x8x1xf32, #tpu.memory_space<vmem>>, vector<1x8x1xf32>,
    %c0_69 = arith.constant 0 : index
    %c12 = arith.constant 12 : index
    %113 = vector.load %arg12[%c0_69, %c12] : memref<8x32xbf16, #tpu.memory_space<vmem>>, vector<8x4xbf16>
    %114 = vector.extract_strided_slice %11 {offsets = [0, 12], sizes = [8, 4], strides = [1, 1]} : vector<8x32xbf16> to vector<8x4xbf16>
    %cst_70 = arith.constant dense<0.000000e+00> : vector<8x8xf32>
    %115 = tpu.matmul %113, %114, %cst_70 {dimension_numbers = #tpu.dot_dimension_numbers<[1], [1], [0], [0], [0, 0, 1, 0], [], []>} : vector<8x4xbf16>, vector<8x4xbf16>, vector<8x8xf32> -> vector<8x8xf32>
    %c3 = arith.constant 3 : index
    %c0_71 = arith.constant 0 : index
    %c0_72 = arith.constant 0 : index
    %116 = vector.load %arg13[%c3, %c0_71, %c0_72] : memref<8x8x1xf32, #tpu.memory_space<vmem>>, vector<1x8x1xf32>
    %117 = vector.shape_cast %116 : vector<1x8x1xf32> to vector<8x1xf32>
    %cst_73 = arith.constant dense<0xFF800000> : vector<8xf32>
    %118 = vector.multi_reduction <maximumf>, %115, %cst_73 [1] : vector<8x8xf32> to vector<8xf32>
    %119 = vector.shape_cast %118 : vector<8xf32> to vector<8x1xf32>
    %120 = arith.maximumf %117, %119 : vector<8x1xf32>
    %121 = arith.subf %117, %120 : vector<8x1xf32>
    %122 = math.exp %121 : vector<8x1xf32>
    %123 = vector.broadcast %120 : vector<8x1xf32> to vector<8x8xf32>
    %124 = arith.subf %115, %123 : vector<8x8xf32>
    %125 = math.exp %124 : vector<8x8xf32>
    %c3_74 = arith.constant 3 : index
    %c0_75 = arith.constant 0 : index
    %c0_76 = arith.constant 0 : index
    %126 = vector.load %arg14[%c3_74, %c0_75, %c0_76] : memref<8x8x1xf32, #tpu.memory_space<vmem>>, vector<1x8x1xf32>
    %127 = vector.shape_cast %126 : vector<1x8x1xf32> to vector<8x1xf32>
    %128 = arith.mulf %122, %127 : vector<8x1xf32>
    %cst_77 = arith.constant dense<0.000000e+00> : vector<8xf32>
    %129 = vector.multi_reduction <add>, %125, %cst_77 [1] : vector<8x8xf32> to vector<8xf32>
    %130 = vector.shape_cast %129 : vector<8xf32> to vector<8x1xf32>
    %131 = arith.addf %128, %130 : vector<8x1xf32>
    %c3_78 = arith.constant 3 : index
    %c0_79 = arith.constant 0 : index
    %c0_80 = arith.constant 0 : index
    %132 = vector.load %arg14[%c3_78, %c0_79, %c0_80] : memref<8x8x1xf32, #tpu.memory_space<vmem>>, vector<1x8x1xf32>
    %133 = vector.shape_cast %132 : vector<1x8x1xf32> to vector<8x1xf32>
    %134 = vector.shape_cast %131 : vector<8x1xf32> to vector<1x8x1xf32>
    tpu.vector_store %arg14[%c3_78, %c0_79, %c0_80], %134 {strides = array<i32>} : memref<8x8x1xf32, #tpu.memory_space<vmem>>, vector<1x8x1xf32>,
    %135 = arith.truncf %125 : vector<8x8xf32> to vector<8x8xbf16>
    %136 = vector.extract_strided_slice %13 {offsets = [0, 12], sizes = [8, 4], strides = [1, 1]} : vector<8x32xbf16> to vector<8x4xbf16>
    %cst_81 = arith.constant dense<0.000000e+00> : vector<8x4xf32>
    %137 = tpu.matmul %135, %136, %cst_81 {dimension_numbers = #tpu.dot_dimension_numbers<[1], [0], [0], [1], [0, 0, 1, 1], [], []>} : vector<8x8xbf16>, vector<8x4xbf16>, vector<8x4xf32> -> vector<8x4xf32>
    %c0_82 = arith.constant 0 : index
    %c12_83 = arith.constant 12 : index
    %138 = vector.load %arg15[%c0_82, %c12_83] : memref<8x32xf32, #tpu.memory_space<vmem>>, vector<8x4xf32>
    %139 = vector.broadcast %122 : vector<8x1xf32> to vector<8x4xf32>
    %140 = arith.mulf %139, %138 : vector<8x4xf32>
    %141 = arith.addf %140, %137 : vector<8x4xf32>
    %c0_84 = arith.constant 0 : index
    %c12_85 = arith.constant 12 : index
    %142 = vector.load %arg15[%c0_84, %c12_85] : memref<8x32xf32, #tpu.memory_space<vmem>>, vector<8x4xf32>
    tpu.vector_store %arg15[%c0_84, %c12_85], %141 {strides = array<i32>} : memref<8x32xf32, #tpu.memory_space<vmem>>, vector<8x4xf32>,
    %c3_86 = arith.constant 3 : index
    %c0_87 = arith.constant 0 : index
    %c0_88 = arith.constant 0 : index
    %143 = vector.load %arg13[%c3_86, %c0_87, %c0_88] : memref<8x8x1xf32, #tpu.memory_space<vmem>>, vector<1x8x1xf32>
    %144 = vector.shape_cast %143 : vector<1x8x1xf32> to vector<8x1xf32>
    %145 = vector.shape_cast %120 : vector<8x1xf32> to vector<1x8x1xf32>
    tpu.vector_store %arg13[%c3_86, %c0_87, %c0_88], %145 {strides = array<i32>} : memref<8x8x1xf32, #tpu.memory_space<vmem>>, vector<1x8x1xf32>,
    %c0_89 = arith.constant 0 : index
    %c16 = arith.constant 16 : index
    %146 = vector.load %arg12[%c0_89, %c16] : memref<8x32xbf16, #tpu.memory_space<vmem>>, vector<8x4xbf16>
    %147 = vector.extract_strided_slice %11 {offsets = [0, 16], sizes = [8, 4], strides = [1, 1]} : vector<8x32xbf16> to vector<8x4xbf16>
    %cst_90 = arith.constant dense<0.000000e+00> : vector<8x8xf32>
    %148 = tpu.matmul %146, %147, %cst_90 {dimension_numbers = #tpu.dot_dimension_numbers<[1], [1], [0], [0], [0, 0, 1, 0], [], []>} : vector<8x4xbf16>, vector<8x4xbf16>, vector<8x8xf32> -> vector<8x8xf32>
    %c4_91 = arith.constant 4 : index
    %c0_92 = arith.constant 0 : index
    %c0_93 = arith.constant 0 : index
    %149 = vector.load %arg13[%c4_91, %c0_92, %c0_93] : memref<8x8x1xf32, #tpu.memory_space<vmem>>, vector<1x8x1xf32>
    %150 = vector.shape_cast %149 : vector<1x8x1xf32> to vector<8x1xf32>
    %cst_94 = arith.constant dense<0xFF800000> : vector<8xf32>
    %151 = vector.multi_reduction <maximumf>, %148, %cst_94 [1] : vector<8x8xf32> to vector<8xf32>
    %152 = vector.shape_cast %151 : vector<8xf32> to vector<8x1xf32>
    %153 = arith.maximumf %150, %152 : vector<8x1xf32>
    %154 = arith.subf %150, %153 : vector<8x1xf32>
    %155 = math.exp %154 : vector<8x1xf32>
    %156 = vector.broadcast %153 : vector<8x1xf32> to vector<8x8xf32>
    %157 = arith.subf %148, %156 : vector<8x8xf32>
    %158 = math.exp %157 : vector<8x8xf32>
    %c4_95 = arith.constant 4 : index
    %c0_96 = arith.constant 0 : index
    %c0_97 = arith.constant 0 : index
    %159 = vector.load %arg14[%c4_95, %c0_96, %c0_97] : memref<8x8x1xf32, #tpu.memory_space<vmem>>, vector<1x8x1xf32>
    %160 = vector.shape_cast %159 : vector<1x8x1xf32> to vector<8x1xf32>
    %161 = arith.mulf %155, %160 : vector<8x1xf32>
    %cst_98 = arith.constant dense<0.000000e+00> : vector<8xf32>
    %162 = vector.multi_reduction <add>, %158, %cst_98 [1] : vector<8x8xf32> to vector<8xf32>
    %163 = vector.shape_cast %162 : vector<8xf32> to vector<8x1xf32>
    %164 = arith.addf %161, %163 : vector<8x1xf32>
    %c4_99 = arith.constant 4 : index
    %c0_100 = arith.constant 0 : index
    %c0_101 = arith.constant 0 : index
    %165 = vector.load %arg14[%c4_99, %c0_100, %c0_101] : memref<8x8x1xf32, #tpu.memory_space<vmem>>, vector<1x8x1xf32>
    %166 = vector.shape_cast %165 : vector<1x8x1xf32> to vector<8x1xf32>
    %167 = vector.shape_cast %164 : vector<8x1xf32> to vector<1x8x1xf32>
    tpu.vector_store %arg14[%c4_99, %c0_100, %c0_101], %167 {strides = array<i32>} : memref<8x8x1xf32, #tpu.memory_space<vmem>>, vector<1x8x1xf32>,
    %168 = arith.truncf %158 : vector<8x8xf32> to vector<8x8xbf16>
    %169 = vector.extract_strided_slice %13 {offsets = [0, 16], sizes = [8, 4], strides = [1, 1]} : vector<8x32xbf16> to vector<8x4xbf16>
    %cst_102 = arith.constant dense<0.000000e+00> : vector<8x4xf32>
    %170 = tpu.matmul %168, %169, %cst_102 {dimension_numbers = #tpu.dot_dimension_numbers<[1], [0], [0], [1], [0, 0, 1, 1], [], []>} : vector<8x8xbf16>, vector<8x4xbf16>, vector<8x4xf32> -> vector<8x4xf32>
    %c0_103 = arith.constant 0 : index
    %c16_104 = arith.constant 16 : index
    %171 = vector.load %arg15[%c0_103, %c16_104] : memref<8x32xf32, #tpu.memory_space<vmem>>, vector<8x4xf32>
    %172 = vector.broadcast %155 : vector<8x1xf32> to vector<8x4xf32>
    %173 = arith.mulf %172, %171 : vector<8x4xf32>
    %174 = arith.addf %173, %170 : vector<8x4xf32>
    %c0_105 = arith.constant 0 : index
    %c16_106 = arith.constant 16 : index
    %175 = vector.load %arg15[%c0_105, %c16_106] : memref<8x32xf32, #tpu.memory_space<vmem>>, vector<8x4xf32>
    tpu.vector_store %arg15[%c0_105, %c16_106], %174 {strides = array<i32>} : memref<8x32xf32, #tpu.memory_space<vmem>>, vector<8x4xf32>,
    %c4_107 = arith.constant 4 : index
    %c0_108 = arith.constant 0 : index
    %c0_109 = arith.constant 0 : index
    %176 = vector.load %arg13[%c4_107, %c0_108, %c0_109] : memref<8x8x1xf32, #tpu.memory_space<vmem>>, vector<1x8x1xf32>
    %177 = vector.shape_cast %176 : vector<1x8x1xf32> to vector<8x1xf32>
    %178 = vector.shape_cast %153 : vector<8x1xf32> to vector<1x8x1xf32>
    tpu.vector_store %arg13[%c4_107, %c0_108, %c0_109], %178 {strides = array<i32>} : memref<8x8x1xf32, #tpu.memory_space<vmem>>, vector<1x8x1xf32>,
    %c0_110 = arith.constant 0 : index
    %c20 = arith.constant 20 : index
    %179 = vector.load %arg12[%c0_110, %c20] : memref<8x32xbf16, #tpu.memory_space<vmem>>, vector<8x4xbf16>
    %180 = vector.extract_strided_slice %11 {offsets = [0, 20], sizes = [8, 4], strides = [1, 1]} : vector<8x32xbf16> to vector<8x4xbf16>
    %cst_111 = arith.constant dense<0.000000e+00> : vector<8x8xf32>
    %181 = tpu.matmul %179, %180, %cst_111 {dimension_numbers = #tpu.dot_dimension_numbers<[1], [1], [0], [0], [0, 0, 1, 0], [], []>} : vector<8x4xbf16>, vector<8x4xbf16>, vector<8x8xf32> -> vector<8x8xf32>
    %c5 = arith.constant 5 : index
    %c0_112 = arith.constant 0 : index
    %c0_113 = arith.constant 0 : index
    %182 = vector.load %arg13[%c5, %c0_112, %c0_113] : memref<8x8x1xf32, #tpu.memory_space<vmem>>, vector<1x8x1xf32>
    %183 = vector.shape_cast %182 : vector<1x8x1xf32> to vector<8x1xf32>
    %cst_114 = arith.constant dense<0xFF800000> : vector<8xf32>
    %184 = vector.multi_reduction <maximumf>, %181, %cst_114 [1] : vector<8x8xf32> to vector<8xf32>
    %185 = vector.shape_cast %184 : vector<8xf32> to vector<8x1xf32>
    %186 = arith.maximumf %183, %185 : vector<8x1xf32>
    %187 = arith.subf %183, %186 : vector<8x1xf32>
    %188 = math.exp %187 : vector<8x1xf32>
    %189 = vector.broadcast %186 : vector<8x1xf32> to vector<8x8xf32>
    %190 = arith.subf %181, %189 : vector<8x8xf32>
    %191 = math.exp %190 : vector<8x8xf32>
    %c5_115 = arith.constant 5 : index
    %c0_116 = arith.constant 0 : index
    %c0_117 = arith.constant 0 : index
    %192 = vector.load %arg14[%c5_115, %c0_116, %c0_117] : memref<8x8x1xf32, #tpu.memory_space<vmem>>, vector<1x8x1xf32>
    %193 = vector.shape_cast %192 : vector<1x8x1xf32> to vector<8x1xf32>
    %194 = arith.mulf %188, %193 : vector<8x1xf32>
    %cst_118 = arith.constant dense<0.000000e+00> : vector<8xf32>
    %195 = vector.multi_reduction <add>, %191, %cst_118 [1] : vector<8x8xf32> to vector<8xf32>
    %196 = vector.shape_cast %195 : vector<8xf32> to vector<8x1xf32>
    %197 = arith.addf %194, %196 : vector<8x1xf32>
    %c5_119 = arith.constant 5 : index
    %c0_120 = arith.constant 0 : index
    %c0_121 = arith.constant 0 : index
    %198 = vector.load %arg14[%c5_119, %c0_120, %c0_121] : memref<8x8x1xf32, #tpu.memory_space<vmem>>, vector<1x8x1xf32>
    %199 = vector.shape_cast %198 : vector<1x8x1xf32> to vector<8x1xf32>
    %200 = vector.shape_cast %197 : vector<8x1xf32> to vector<1x8x1xf32>
    tpu.vector_store %arg14[%c5_119, %c0_120, %c0_121], %200 {strides = array<i32>} : memref<8x8x1xf32, #tpu.memory_space<vmem>>, vector<1x8x1xf32>,
    %201 = arith.truncf %191 : vector<8x8xf32> to vector<8x8xbf16>
    %202 = vector.extract_strided_slice %13 {offsets = [0, 20], sizes = [8, 4], strides = [1, 1]} : vector<8x32xbf16> to vector<8x4xbf16>
    %cst_122 = arith.constant dense<0.000000e+00> : vector<8x4xf32>
    %203 = tpu.matmul %201, %202, %cst_122 {dimension_numbers = #tpu.dot_dimension_numbers<[1], [0], [0], [1], [0, 0, 1, 1], [], []>} : vector<8x8xbf16>, vector<8x4xbf16>, vector<8x4xf32> -> vector<8x4xf32>
    %c0_123 = arith.constant 0 : index
    %c20_124 = arith.constant 20 : index
    %204 = vector.load %arg15[%c0_123, %c20_124] : memref<8x32xf32, #tpu.memory_space<vmem>>, vector<8x4xf32>
    %205 = vector.broadcast %188 : vector<8x1xf32> to vector<8x4xf32>
    %206 = arith.mulf %205, %204 : vector<8x4xf32>
    %207 = arith.addf %206, %203 : vector<8x4xf32>
    %c0_125 = arith.constant 0 : index
    %c20_126 = arith.constant 20 : index
    %208 = vector.load %arg15[%c0_125, %c20_126] : memref<8x32xf32, #tpu.memory_space<vmem>>, vector<8x4xf32>
    tpu.vector_store %arg15[%c0_125, %c20_126], %207 {strides = array<i32>} : memref<8x32xf32, #tpu.memory_space<vmem>>, vector<8x4xf32>,
    %c5_127 = arith.constant 5 : index
    %c0_128 = arith.constant 0 : index
    %c0_129 = arith.constant 0 : index
    %209 = vector.load %arg13[%c5_127, %c0_128, %c0_129] : memref<8x8x1xf32, #tpu.memory_space<vmem>>, vector<1x8x1xf32>
    %210 = vector.shape_cast %209 : vector<1x8x1xf32> to vector<8x1xf32>
    %211 = vector.shape_cast %186 : vector<8x1xf32> to vector<1x8x1xf32>
    tpu.vector_store %arg13[%c5_127, %c0_128, %c0_129], %211 {strides = array<i32>} : memref<8x8x1xf32, #tpu.memory_space<vmem>>, vector<1x8x1xf32>,
    %c0_130 = arith.constant 0 : index
    %c24 = arith.constant 24 : index
    %212 = vector.load %arg12[%c0_130, %c24] : memref<8x32xbf16, #tpu.memory_space<vmem>>, vector<8x4xbf16>
    %213 = vector.extract_strided_slice %11 {offsets = [0, 24], sizes = [8, 4], strides = [1, 1]} : vector<8x32xbf16> to vector<8x4xbf16>
    %cst_131 = arith.constant dense<0.000000e+00> : vector<8x8xf32>
    %214 = tpu.matmul %212, %213, %cst_131 {dimension_numbers = #tpu.dot_dimension_numbers<[1], [1], [0], [0], [0, 0, 1, 0], [], []>} : vector<8x4xbf16>, vector<8x4xbf16>, vector<8x8xf32> -> vector<8x8xf32>
    %c6 = arith.constant 6 : index
    %c0_132 = arith.constant 0 : index
    %c0_133 = arith.constant 0 : index
    %215 = vector.load %arg13[%c6, %c0_132, %c0_133] : memref<8x8x1xf32, #tpu.memory_space<vmem>>, vector<1x8x1xf32>
    %216 = vector.shape_cast %215 : vector<1x8x1xf32> to vector<8x1xf32>
    %cst_134 = arith.constant dense<0xFF800000> : vector<8xf32>
    %217 = vector.multi_reduction <maximumf>, %214, %cst_134 [1] : vector<8x8xf32> to vector<8xf32>
    %218 = vector.shape_cast %217 : vector<8xf32> to vector<8x1xf32>
    %219 = arith.maximumf %216, %218 : vector<8x1xf32>
    %220 = arith.subf %216, %219 : vector<8x1xf32>
    %221 = math.exp %220 : vector<8x1xf32>
    %222 = vector.broadcast %219 : vector<8x1xf32> to vector<8x8xf32>
    %223 = arith.subf %214, %222 : vector<8x8xf32>
    %224 = math.exp %223 : vector<8x8xf32>
    %c6_135 = arith.constant 6 : index
    %c0_136 = arith.constant 0 : index
    %c0_137 = arith.constant 0 : index
    %225 = vector.load %arg14[%c6_135, %c0_136, %c0_137] : memref<8x8x1xf32, #tpu.memory_space<vmem>>, vector<1x8x1xf32>
    %226 = vector.shape_cast %225 : vector<1x8x1xf32> to vector<8x1xf32>
    %227 = arith.mulf %221, %226 : vector<8x1xf32>
    %cst_138 = arith.constant dense<0.000000e+00> : vector<8xf32>
    %228 = vector.multi_reduction <add>, %224, %cst_138 [1] : vector<8x8xf32> to vector<8xf32>
    %229 = vector.shape_cast %228 : vector<8xf32> to vector<8x1xf32>
    %230 = arith.addf %227, %229 : vector<8x1xf32>
    %c6_139 = arith.constant 6 : index
    %c0_140 = arith.constant 0 : index
    %c0_141 = arith.constant 0 : index
    %231 = vector.load %arg14[%c6_139, %c0_140, %c0_141] : memref<8x8x1xf32, #tpu.memory_space<vmem>>, vector<1x8x1xf32>
    %232 = vector.shape_cast %231 : vector<1x8x1xf32> to vector<8x1xf32>
    %233 = vector.shape_cast %230 : vector<8x1xf32> to vector<1x8x1xf32>
    tpu.vector_store %arg14[%c6_139, %c0_140, %c0_141], %233 {strides = array<i32>} : memref<8x8x1xf32, #tpu.memory_space<vmem>>, vector<1x8x1xf32>,
    %234 = arith.truncf %224 : vector<8x8xf32> to vector<8x8xbf16>
    %235 = vector.extract_strided_slice %13 {offsets = [0, 24], sizes = [8, 4], strides = [1, 1]} : vector<8x32xbf16> to vector<8x4xbf16>
    %cst_142 = arith.constant dense<0.000000e+00> : vector<8x4xf32>
    %236 = tpu.matmul %234, %235, %cst_142 {dimension_numbers = #tpu.dot_dimension_numbers<[1], [0], [0], [1], [0, 0, 1, 1], [], []>} : vector<8x8xbf16>, vector<8x4xbf16>, vector<8x4xf32> -> vector<8x4xf32>
    %c0_143 = arith.constant 0 : index
    %c24_144 = arith.constant 24 : index
    %237 = vector.load %arg15[%c0_143, %c24_144] : memref<8x32xf32, #tpu.memory_space<vmem>>, vector<8x4xf32>
    %238 = vector.broadcast %221 : vector<8x1xf32> to vector<8x4xf32>
    %239 = arith.mulf %238, %237 : vector<8x4xf32>
    %240 = arith.addf %239, %236 : vector<8x4xf32>
    %c0_145 = arith.constant 0 : index
    %c24_146 = arith.constant 24 : index
    %241 = vector.load %arg15[%c0_145, %c24_146] : memref<8x32xf32, #tpu.memory_space<vmem>>, vector<8x4xf32>
    tpu.vector_store %arg15[%c0_145, %c24_146], %240 {strides = array<i32>} : memref<8x32xf32, #tpu.memory_space<vmem>>, vector<8x4xf32>,
    %c6_147 = arith.constant 6 : index
    %c0_148 = arith.constant 0 : index
    %c0_149 = arith.constant 0 : index
    %242 = vector.load %arg13[%c6_147, %c0_148, %c0_149] : memref<8x8x1xf32, #tpu.memory_space<vmem>>, vector<1x8x1xf32>
    %243 = vector.shape_cast %242 : vector<1x8x1xf32> to vector<8x1xf32>
    %244 = vector.shape_cast %219 : vector<8x1xf32> to vector<1x8x1xf32>
    tpu.vector_store %arg13[%c6_147, %c0_148, %c0_149], %244 {strides = array<i32>} : memref<8x8x1xf32, #tpu.memory_space<vmem>>, vector<1x8x1xf32>,
    %c0_150 = arith.constant 0 : index
    %c28 = arith.constant 28 : index
    %245 = vector.load %arg12[%c0_150, %c28] : memref<8x32xbf16, #tpu.memory_space<vmem>>, vector<8x4xbf16>
    %246 = vector.extract_strided_slice %11 {offsets = [0, 28], sizes = [8, 4], strides = [1, 1]} : vector<8x32xbf16> to vector<8x4xbf16>
    %cst_151 = arith.constant dense<0.000000e+00> : vector<8x8xf32>
    %247 = tpu.matmul %245, %246, %cst_151 {dimension_numbers = #tpu.dot_dimension_numbers<[1], [1], [0], [0], [0, 0, 1, 0], [], []>} : vector<8x4xbf16>, vector<8x4xbf16>, vector<8x8xf32> -> vector<8x8xf32>
    %c7 = arith.constant 7 : index
    %c0_152 = arith.constant 0 : index
    %c0_153 = arith.constant 0 : index
    %248 = vector.load %arg13[%c7, %c0_152, %c0_153] : memref<8x8x1xf32, #tpu.memory_space<vmem>>, vector<1x8x1xf32>
    %249 = vector.shape_cast %248 : vector<1x8x1xf32> to vector<8x1xf32>
    %cst_154 = arith.constant dense<0xFF800000> : vector<8xf32>
    %250 = vector.multi_reduction <maximumf>, %247, %cst_154 [1] : vector<8x8xf32> to vector<8xf32>
    %251 = vector.shape_cast %250 : vector<8xf32> to vector<8x1xf32>
    %252 = arith.maximumf %249, %251 : vector<8x1xf32>
    %253 = arith.subf %249, %252 : vector<8x1xf32>
    %254 = math.exp %253 : vector<8x1xf32>
    %255 = vector.broadcast %252 : vector<8x1xf32> to vector<8x8xf32>
    %256 = arith.subf %247, %255 : vector<8x8xf32>
    %257 = math.exp %256 : vector<8x8xf32>
    %c7_155 = arith.constant 7 : index
    %c0_156 = arith.constant 0 : index
    %c0_157 = arith.constant 0 : index
    %258 = vector.load %arg14[%c7_155, %c0_156, %c0_157] : memref<8x8x1xf32, #tpu.memory_space<vmem>>, vector<1x8x1xf32>
    %259 = vector.shape_cast %258 : vector<1x8x1xf32> to vector<8x1xf32>
    %260 = arith.mulf %254, %259 : vector<8x1xf32>
    %cst_158 = arith.constant dense<0.000000e+00> : vector<8xf32>
    %261 = vector.multi_reduction <add>, %257, %cst_158 [1] : vector<8x8xf32> to vector<8xf32>
    %262 = vector.shape_cast %261 : vector<8xf32> to vector<8x1xf32>
    %263 = arith.addf %260, %262 : vector<8x1xf32>
    %c7_159 = arith.constant 7 : index
    %c0_160 = arith.constant 0 : index
    %c0_161 = arith.constant 0 : index
    %264 = vector.load %arg14[%c7_159, %c0_160, %c0_161] : memref<8x8x1xf32, #tpu.memory_space<vmem>>, vector<1x8x1xf32>
    %265 = vector.shape_cast %264 : vector<1x8x1xf32> to vector<8x1xf32>
    %266 = vector.shape_cast %263 : vector<8x1xf32> to vector<1x8x1xf32>
    tpu.vector_store %arg14[%c7_159, %c0_160, %c0_161], %266 {strides = array<i32>} : memref<8x8x1xf32, #tpu.memory_space<vmem>>, vector<1x8x1xf32>,
    %267 = arith.truncf %257 : vector<8x8xf32> to vector<8x8xbf16>
    %268 = vector.extract_strided_slice %13 {offsets = [0, 28], sizes = [8, 4], strides = [1, 1]} : vector<8x32xbf16> to vector<8x4xbf16>
    %cst_162 = arith.constant dense<0.000000e+00> : vector<8x4xf32>
    %269 = tpu.matmul %267, %268, %cst_162 {dimension_numbers = #tpu.dot_dimension_numbers<[1], [0], [0], [1], [0, 0, 1, 1], [], []>} : vector<8x8xbf16>, vector<8x4xbf16>, vector<8x4xf32> -> vector<8x4xf32>
    %c0_163 = arith.constant 0 : index
    %c28_164 = arith.constant 28 : index
    %270 = vector.load %arg15[%c0_163, %c28_164] : memref<8x32xf32, #tpu.memory_space<vmem>>, vector<8x4xf32>
    %271 = vector.broadcast %254 : vector<8x1xf32> to vector<8x4xf32>
    %272 = arith.mulf %271, %270 : vector<8x4xf32>
    %273 = arith.addf %272, %269 : vector<8x4xf32>
    %c0_165 = arith.constant 0 : index
    %c28_166 = arith.constant 28 : index
    %274 = vector.load %arg15[%c0_165, %c28_166] : memref<8x32xf32, #tpu.memory_space<vmem>>, vector<8x4xf32>
    tpu.vector_store %arg15[%c0_165, %c28_166], %273 {strides = array<i32>} : memref<8x32xf32, #tpu.memory_space<vmem>>, vector<8x4xf32>,
    %c7_167 = arith.constant 7 : index
    %c0_168 = arith.constant 0 : index
    %c0_169 = arith.constant 0 : index
    %275 = vector.load %arg13[%c7_167, %c0_168, %c0_169] : memref<8x8x1xf32, #tpu.memory_space<vmem>>, vector<1x8x1xf32>
    %276 = vector.shape_cast %275 : vector<1x8x1xf32> to vector<8x1xf32>
    %277 = vector.shape_cast %252 : vector<8x1xf32> to vector<1x8x1xf32>
    tpu.vector_store %arg13[%c7_167, %c0_168, %c0_169], %277 {strides = array<i32>} : memref<8x8x1xf32, #tpu.memory_space<vmem>>, vector<1x8x1xf32>,
    %c0_i32_170 = arith.constant 0 : i32
    %278 = arith.cmpi eq, %arg2, %c0_i32_170 : i32
    %279 = arith.extui %278 : i1 to i32
    %c0_i32_171 = arith.constant 0 : i32
    %280 = arith.cmpi ne, %279, %c0_i32_171 : i32
    scf.if %280 {
      %c0_172 = arith.constant 0 : index
      %c0_173 = arith.constant 0 : index
      %c0_174 = arith.constant 0 : index
      %281 = vector.load %arg14[%c0_172, %c0_173, %c0_174] : memref<8x8x1xf32, #tpu.memory_space<vmem>>, vector<1x8x1xf32>
      %282 = vector.shape_cast %281 : vector<1x8x1xf32> to vector<8x1xf32>
      %283 = tpu.reciprocal %282 {approx = true} : vector<8x1xf32> -> vector<8x1xf32>
      %c0_175 = arith.constant 0 : index
      %c0_176 = arith.constant 0 : index
      %284 = vector.load %arg15[%c0_175, %c0_176] : memref<8x32xf32, #tpu.memory_space<vmem>>, vector<8x4xf32>
      %285 = vector.broadcast %283 : vector<8x1xf32> to vector<8x4xf32>
      %286 = arith.mulf %284, %285 : vector<8x4xf32>
      %c0_177 = arith.constant 0 : index
      %c0_178 = arith.constant 0 : index
      %287 = vector.load %arg15[%c0_177, %c0_178] : memref<8x32xf32, #tpu.memory_space<vmem>>, vector<8x4xf32>
      tpu.vector_store %arg15[%c0_177, %c0_178], %286 {strides = array<i32>} : memref<8x32xf32, #tpu.memory_space<vmem>>, vector<8x4xf32>,
      %c1_179 = arith.constant 1 : index
      %c0_180 = arith.constant 0 : index
      %c0_181 = arith.constant 0 : index
      %288 = vector.load %arg14[%c1_179, %c0_180, %c0_181] : memref<8x8x1xf32, #tpu.memory_space<vmem>>, vector<1x8x1xf32>
      %289 = vector.shape_cast %288 : vector<1x8x1xf32> to vector<8x1xf32>
      %290 = tpu.reciprocal %289 {approx = true} : vector<8x1xf32> -> vector<8x1xf32>
      %c0_182 = arith.constant 0 : index
      %c4_183 = arith.constant 4 : index
      %291 = vector.load %arg15[%c0_182, %c4_183] : memref<8x32xf32, #tpu.memory_space<vmem>>, vector<8x4xf32>
      %292 = vector.broadcast %290 : vector<8x1xf32> to vector<8x4xf32>
      %293 = arith.mulf %291, %292 : vector<8x4xf32>
      %c0_184 = arith.constant 0 : index
      %c4_185 = arith.constant 4 : index
      %294 = vector.load %arg15[%c0_184, %c4_185] : memref<8x32xf32, #tpu.memory_space<vmem>>, vector<8x4xf32>
      tpu.vector_store %arg15[%c0_184, %c4_185], %293 {strides = array<i32>} : memref<8x32xf32, #tpu.memory_space<vmem>>, vector<8x4xf32>,
      %c2_186 = arith.constant 2 : index
      %c0_187 = arith.constant 0 : index
      %c0_188 = arith.constant 0 : index
      %295 = vector.load %arg14[%c2_186, %c0_187, %c0_188] : memref<8x8x1xf32, #tpu.memory_space<vmem>>, vector<1x8x1xf32>
      %296 = vector.shape_cast %295 : vector<1x8x1xf32> to vector<8x1xf32>
      %297 = tpu.reciprocal %296 {approx = true} : vector<8x1xf32> -> vector<8x1xf32>
      %c0_189 = arith.constant 0 : index
      %c8_190 = arith.constant 8 : index
      %298 = vector.load %arg15[%c0_189, %c8_190] : memref<8x32xf32, #tpu.memory_space<vmem>>, vector<8x4xf32>
      %299 = vector.broadcast %297 : vector<8x1xf32> to vector<8x4xf32>
      %300 = arith.mulf %298, %299 : vector<8x4xf32>
      %c0_191 = arith.constant 0 : index
      %c8_192 = arith.constant 8 : index
      %301 = vector.load %arg15[%c0_191, %c8_192] : memref<8x32xf32, #tpu.memory_space<vmem>>, vector<8x4xf32>
      tpu.vector_store %arg15[%c0_191, %c8_192], %300 {strides = array<i32>} : memref<8x32xf32, #tpu.memory_space<vmem>>, vector<8x4xf32>,
      %c3_193 = arith.constant 3 : index
      %c0_194 = arith.constant 0 : index
      %c0_195 = arith.constant 0 : index
      %302 = vector.load %arg14[%c3_193, %c0_194, %c0_195] : memref<8x8x1xf32, #tpu.memory_space<vmem>>, vector<1x8x1xf32>
      %303 = vector.shape_cast %302 : vector<1x8x1xf32> to vector<8x1xf32>
      %304 = tpu.reciprocal %303 {approx = true} : vector<8x1xf32> -> vector<8x1xf32>
      %c0_196 = arith.constant 0 : index
      %c12_197 = arith.constant 12 : index
      %305 = vector.load %arg15[%c0_196, %c12_197] : memref<8x32xf32, #tpu.memory_space<vmem>>, vector<8x4xf32>
      %306 = vector.broadcast %304 : vector<8x1xf32> to vector<8x4xf32>
      %307 = arith.mulf %305, %306 : vector<8x4xf32>
      %c0_198 = arith.constant 0 : index
      %c12_199 = arith.constant 12 : index
      %308 = vector.load %arg15[%c0_198, %c12_199] : memref<8x32xf32, #tpu.memory_space<vmem>>, vector<8x4xf32>
      tpu.vector_store %arg15[%c0_198, %c12_199], %307 {strides = array<i32>} : memref<8x32xf32, #tpu.memory_space<vmem>>, vector<8x4xf32>,
      %c4_200 = arith.constant 4 : index
      %c0_201 = arith.constant 0 : index
      %c0_202 = arith.constant 0 : index
      %309 = vector.load %arg14[%c4_200, %c0_201, %c0_202] : memref<8x8x1xf32, #tpu.memory_space<vmem>>, vector<1x8x1xf32>
      %310 = vector.shape_cast %309 : vector<1x8x1xf32> to vector<8x1xf32>
      %311 = tpu.reciprocal %310 {approx = true} : vector<8x1xf32> -> vector<8x1xf32>
      %c0_203 = arith.constant 0 : index
      %c16_204 = arith.constant 16 : index
      %312 = vector.load %arg15[%c0_203, %c16_204] : memref<8x32xf32, #tpu.memory_space<vmem>>, vector<8x4xf32>
      %313 = vector.broadcast %311 : vector<8x1xf32> to vector<8x4xf32>
      %314 = arith.mulf %312, %313 : vector<8x4xf32>
      %c0_205 = arith.constant 0 : index
      %c16_206 = arith.constant 16 : index
      %315 = vector.load %arg15[%c0_205, %c16_206] : memref<8x32xf32, #tpu.memory_space<vmem>>, vector<8x4xf32>
      tpu.vector_store %arg15[%c0_205, %c16_206], %314 {strides = array<i32>} : memref<8x32xf32, #tpu.memory_space<vmem>>, vector<8x4xf32>,
      %c5_207 = arith.constant 5 : index
      %c0_208 = arith.constant 0 : index
      %c0_209 = arith.constant 0 : index
      %316 = vector.load %arg14[%c5_207, %c0_208, %c0_209] : memref<8x8x1xf32, #tpu.memory_space<vmem>>, vector<1x8x1xf32>
      %317 = vector.shape_cast %316 : vector<1x8x1xf32> to vector<8x1xf32>
      %318 = tpu.reciprocal %317 {approx = true} : vector<8x1xf32> -> vector<8x1xf32>
      %c0_210 = arith.constant 0 : index
      %c20_211 = arith.constant 20 : index
      %319 = vector.load %arg15[%c0_210, %c20_211] : memref<8x32xf32, #tpu.memory_space<vmem>>, vector<8x4xf32>
      %320 = vector.broadcast %318 : vector<8x1xf32> to vector<8x4xf32>
      %321 = arith.mulf %319, %320 : vector<8x4xf32>
      %c0_212 = arith.constant 0 : index
      %c20_213 = arith.constant 20 : index
      %322 = vector.load %arg15[%c0_212, %c20_213] : memref<8x32xf32, #tpu.memory_space<vmem>>, vector<8x4xf32>
      tpu.vector_store %arg15[%c0_212, %c20_213], %321 {strides = array<i32>} : memref<8x32xf32, #tpu.memory_space<vmem>>, vector<8x4xf32>,
      %c6_214 = arith.constant 6 : index
      %c0_215 = arith.constant 0 : index
      %c0_216 = arith.constant 0 : index
      %323 = vector.load %arg14[%c6_214, %c0_215, %c0_216] : memref<8x8x1xf32, #tpu.memory_space<vmem>>, vector<1x8x1xf32>
      %324 = vector.shape_cast %323 : vector<1x8x1xf32> to vector<8x1xf32>
      %325 = tpu.reciprocal %324 {approx = true} : vector<8x1xf32> -> vector<8x1xf32>
      %c0_217 = arith.constant 0 : index
      %c24_218 = arith.constant 24 : index
      %326 = vector.load %arg15[%c0_217, %c24_218] : memref<8x32xf32, #tpu.memory_space<vmem>>, vector<8x4xf32>
      %327 = vector.broadcast %325 : vector<8x1xf32> to vector<8x4xf32>
      %328 = arith.mulf %326, %327 : vector<8x4xf32>
      %c0_219 = arith.constant 0 : index
      %c24_220 = arith.constant 24 : index
      %329 = vector.load %arg15[%c0_219, %c24_220] : memref<8x32xf32, #tpu.memory_space<vmem>>, vector<8x4xf32>
      tpu.vector_store %arg15[%c0_219, %c24_220], %328 {strides = array<i32>} : memref<8x32xf32, #tpu.memory_space<vmem>>, vector<8x4xf32>,
      %c7_221 = arith.constant 7 : index
      %c0_222 = arith.constant 0 : index
      %c0_223 = arith.constant 0 : index
      %330 = vector.load %arg14[%c7_221, %c0_222, %c0_223] : memref<8x8x1xf32, #tpu.memory_space<vmem>>, vector<1x8x1xf32>
      %331 = vector.shape_cast %330 : vector<1x8x1xf32> to vector<8x1xf32>
      %332 = tpu.reciprocal %331 {approx = true} : vector<8x1xf32> -> vector<8x1xf32>
      %c0_224 = arith.constant 0 : index
      %c28_225 = arith.constant 28 : index
      %333 = vector.load %arg15[%c0_224, %c28_225] : memref<8x32xf32, #tpu.memory_space<vmem>>, vector<8x4xf32>
      %334 = vector.broadcast %332 : vector<8x1xf32> to vector<8x4xf32>
      %335 = arith.mulf %333, %334 : vector<8x4xf32>
      %c0_226 = arith.constant 0 : index
      %c28_227 = arith.constant 28 : index
      %336 = vector.load %arg15[%c0_226, %c28_227] : memref<8x32xf32, #tpu.memory_space<vmem>>, vector<8x4xf32>
      tpu.vector_store %arg15[%c0_226, %c28_227], %335 {strides = array<i32>} : memref<8x32xf32, #tpu.memory_space<vmem>>, vector<8x4xf32>,
      %c0_228 = arith.constant 0 : index
      %c0_229 = arith.constant 0 : index
      %337 = vector.load %arg15[%c0_228, %c0_229] : memref<8x32xf32, #tpu.memory_space<vmem>>, vector<8x32xf32>
      %338 = arith.truncf %337 : vector<8x32xf32> to vector<8x32xbf16>
      %c0_230 = arith.constant 0 : index
      %c0_231 = arith.constant 0 : index
      %339 = vector.load %arg9[%c0_230, %c0_231] : memref<32x32xbf16, #tpu.memory_space<vmem>>, vector<32x32xbf16>
      %cst_232 = arith.constant dense<0.000000e+00> : vector<8x32xf32>
      %340 = tpu.matmul %338, %339, %cst_232 {dimension_numbers = #tpu.dot_dimension_numbers<[1], [1], [0], [0], [0, 0, 1, 0], [], []>} : vector<8x32xbf16>, vector<32x32xbf16>, vector<8x32xf32> -> vector<8x32xf32>
      %c0_233 = arith.constant 0 : index
      %c0_234 = arith.constant 0 : index
      %341 = vector.load %arg10[%c0_233, %c0_234] : memref<1x32xf32, #tpu.memory_space<vmem>>, vector<1x32xf32>
      %342 = vector.broadcast %341 : vector<1x32xf32> to vector<8x32xf32>
      %343 = arith.addf %340, %342 : vector<8x32xf32>
      %c0_235 = arith.constant 0 : index
      %c0_236 = arith.constant 0 : index
      %c0_237 = arith.constant 0 : index
      %344 = vector.load %arg11[%c0_235, %c0_236, %c0_237] : memref<1x8x32xf32, #tpu.memory_space<vmem>>, vector<1x8x32xf32>
      %345 = vector.shape_cast %344 : vector<1x8x32xf32> to vector<8x32xf32>
      %346 = vector.shape_cast %343 : vector<8x32xf32> to vector<1x8x32xf32>
      tpu.vector_store %arg11[%c0_235, %c0_236, %c0_237], %346 {strides = array<i32>} : memref<1x8x32xf32, #tpu.memory_space<vmem>>, vector<1x8x32xf32>,
    } else {
    }
    return
  }
  func.func @transform_0(%arg0: i32, %arg1: i32, %arg2: i32) -> (i32, i32, i32) {
    %c0_i32 = arith.constant 0 : i32
    %c0_i32_0 = arith.constant 0 : i32
    return %arg0, %arg1, %c0_i32 : i32, i32, i32
  }
  func.func @transform_1(%arg0: i32, %arg1: i32, %arg2: i32) -> (i32, i32, i32) {
    %c0_i32 = arith.constant 0 : i32
    %c0_i32_0 = arith.constant 0 : i32
    return %arg0, %arg2, %c0_i32 : i32, i32, i32
  }
  func.func @transform_2(%arg0: i32, %arg1: i32, %arg2: i32) -> (i32, i32) {
    %c0_i32 = arith.constant 0 : i32
    %c0_i32_0 = arith.constant 0 : i32
    %c0_i32_1 = arith.constant 0 : i32
    return %c0_i32, %c0_i32_0 : i32, i32
  }
  func.func @transform_3(%arg0: i32, %arg1: i32, %arg2: i32) -> (i32, i32) {
    %c0_i32 = arith.constant 0 : i32
    %c0_i32_0 = arith.constant 0 : i32
    %c0_i32_1 = arith.constant 0 : i32
    return %c0_i32, %c0_i32_0 : i32, i32
  }
  func.func @transform_4(%arg0: i32, %arg1: i32, %arg2: i32) -> (i32, i32) {
    %c0_i32 = arith.constant 0 : i32
    %c0_i32_0 = arith.constant 0 : i32
    %c0_i32_1 = arith.constant 0 : i32
    return %c0_i32, %c0_i32_0 : i32, i32
  }
  func.func @transform_5(%arg0: i32, %arg1: i32, %arg2: i32) -> (i32, i32) {
    %c0_i32 = arith.constant 0 : i32
    %c0_i32_0 = arith.constant 0 : i32
    %c0_i32_1 = arith.constant 0 : i32
    return %c0_i32, %c0_i32_0 : i32, i32
  }
  func.func @transform_6(%arg0: i32, %arg1: i32, %arg2: i32) -> (i32, i32) {
    %c0_i32 = arith.constant 0 : i32
    %c0_i32_0 = arith.constant 0 : i32
    %c0_i32_1 = arith.constant 0 : i32
    return %c0_i32, %c0_i32_0 : i32, i32
  }
  func.func @transform_7(%arg0: i32, %arg1: i32, %arg2: i32) -> (i32, i32) {
    %c0_i32 = arith.constant 0 : i32
    %c0_i32_0 = arith.constant 0 : i32
    %c0_i32_1 = arith.constant 0 : i32
    return %c0_i32, %c0_i32_0 : i32, i32
  }
  func.func @transform_8(%arg0: i32, %arg1: i32, %arg2: i32) -> (i32, i32, i32) {
    %c0_i32 = arith.constant 0 : i32
    %c0_i32_0 = arith.constant 0 : i32
    return %arg0, %arg1, %c0_i32 : i32, i32, i32
  }
}

</mosaic_0001>

<bundles_post_ra>
// kernel: tpu_custom_call.1
= control target key start
LH: loop header
LB: loop body
LE: loop exit
PB: predicated region body
PF: predicated region fallthrough
CT: control target
= control target key end

     0   :  { %s2236_s0 = inlined_call_operand.vmem [shape: bf16[2,8,32], index: 0, kind: input, shape index: {}]   ;;  %s2237_s1 = inlined_call_operand.vmem [shape: bf16[2,8,32], index: 1, kind: input, shape index: {}]   ;;  %s2238_s2 = inlined_call_operand.vmem [shape: bf16[32,32], index: 2, kind: input, shape index: {}]   ;;  %s2239_s3 = inlined_call_operand.vmem [shape: f32[1,32], index: 3, kind: input, shape index: {}]   ;;  %s2240_s4 = inlined_call_operand.vmem [shape: bf16[64,32], index: 4, kind: input, shape index: {}]   ;;  %s2241_s5 = inlined_call_operand.vmem [shape: f32[1,64], index: 5, kind: input, shape index: {}]   ;;  %s2242_s6 = inlined_call_operand.vmem [shape: bf16[32,32], index: 6, kind: input, shape index: {}]   ;;  %s2243_s7 = inlined_call_operand.vmem [shape: f32[1,32], index: 7, kind: input, shape index: {}]   ;;  %s2244_s8 = inlined_call_operand.hbm [shape: f32[2,8,32], index: 8, kind: output, shape index: {}]  }
   0x1   :  { %2245 = sst [smem:[#allocation9_spill]] %s2236_s0 }
   0x2   :  { %13 = vsyncpa [#allocation7], 0 }
   0x3   :  { %15 = vsyncpa [#allocation7 + $0x1], 0  ;;  %s1785_s27 = smov 0   ;;  %s1787_s28 = smov 0  }
   0x4   :  { %s1789_s29 = smov 0   ;;  %s1791_s30 = smov 0  }
   0x5   :  { %s1793_s9 = smov 0   ;;  %s1795_s10 = smov 0  }
   0x6 LB: > { %s1430_s11 = sadd.s32 4294967295, %s1713_s10   ;;  %s1431_s12 = sadd.s32 4294967294, %s1713_s10   ;;  %s1713_s10 = sphi %s1795_s10, %s21_s10   ;;  %s1709_s9 = sphi %s1793_s9, %s2253_s9   ;;  %s1705_s30 = sphi %s1791_s30, %s2252_s30   ;;  %s1701_s29 = sphi %s1789_s29, %s2251_s29   ;;  %s1697_s28 = sphi %s1787_s28, %s2250_s28   ;;  %s1693_s27 = sphi %s1785_s27, %s2249_s27  }
   0x7   : > { %s40_s13 = sadd.s32 1, %s1709_s9  ;;  %s231_s14 = sadd.s32 1, %s1701_s29 }
   0x8   : > { %p42_p0 = scmp.ge.s32.totalorder %s40_s13, 2  ;;  %p241_p1 = scmp.ne.s32.totalorder %s1701_s29, %s1697_s28 }
   0x9   : > { %p242_p2 = scmp.eq.s32.totalorder %s1430_s11, 1  ;;  %p247_p3 = scmp.ne.s32.totalorder %s1697_s28, %s1693_s27 }
   0xa   : > { %s2255_s13 = smov (%p42_p0, %s40_s13), 0  ;;  %p248_p5 = scmp.eq.s32.totalorder %s1431_s12, 1 }
   0xb   : > { %p1825_p4 = por %p242_p2, %p241_p1  ;;  %s226_s16 = ssub.s32 %s1709_s9, %s2255_s13 }
   0xc   : > { %p1434_p6 = scmp.ge.s32.totalorder %s1713_s10, 1  ;;  %p229_p7 = scmp.eq.s32.totalorder %s226_s16, 0 }
   0xd   : > { %p1832_p8 = por %p248_p5, %p247_p3  ;;  %p304_p9 = scmp.lt.s32.totalorder %s1713_s10, 3 }
   0xe   : > { %s1838_s18 = scalar_select %p229_p7, %s1701_s29, %s231_s14  }
   0xf   : > { %p305_p10 = pnand %p1434_p6, %p304_p9 }
  0x10   : > { %p347_p11 = scmp.lt.s32.totalorder (!%p305_p10), %s1705_s30, 1  ;;  %s2248_s0 = sld [smem:[#allocation9_spill]] (!%p305_p10) }
  0x11   : > { %308 = sbr.rel (%p305_p10) target bundleno = 2066 (0x812), region = 52  ;;  %s1716_s20 = smov (!%p305_p10), 96  }
  0x12   : > { %s1721_s22 = smov (!%p305_p10), 112   ;;  %s1722_s23 = smov (!%p305_p10), 108  }
  0x13   : > { %s1723_s24 = smov (!%p305_p10), 104   ;;  %s1724_s25 = smov (!%p305_p10), 100  }
  0x14   : > { %s1727_s14 = smov (!%p305_p10), 88   ;;  %s1728_s16 = smov (!%p305_p10), 80  }
  0x15   : > { %s1729_s19 = smov (!%p305_p10), 84  }
  0x16   : > { %vm385_vm0 = vcmask 261120   ;;  %v1498_v0 = vld [vmem:[%s2240_s4 + $0x18] sm:$0xff]  ;;  %v1494_v1 = vld [vmem:[%s2238_s2 + $0x8] sm:$0xff]  ;;  %v1497_v4 = vld [vmem:[%s2240_s4 + $0x10] sm:$0xff]  ;;  %s348_s11 = scalar_select %p347_p11, %s1705_s30, 1  ;;  %vm410_vm1 = vcmask 257024  }
  0x17   : > { %v477_v2 = vsel %vm385_vm0, %v1498_v0, 0  ;;  %v393_v3 = vsel %vm385_vm0, %v1494_v1, 0  ;;  %v1493_v5 = vld [vmem:[%s2238_s2] sm:$0xff]  ;;  %v474_v6 = vsel %vm385_vm0, %v1497_v4, 0  ;;  %v1496_v8 = vld [vmem:[%s2240_s4 + $0x8] sm:$0xff]  ;;  %vm494_vm2 = vcmask 31744  }
  0x18   : > { %483 = vmatpush.bf16.xpose.msra.mxu1 %v477_v2  ;;  %401 = vmatpush.bf16.xpose.msra.mxu0 %v393_v3  ;;  %v390_v7 = vsel %vm385_vm0, %v1493_v5, 0  ;;  %s1436_s12 = sshll.u32 %s348_s11, 2  ;;  %v471_v10 = vsel %vm385_vm0, %v1496_v8, 0  ;;  %v1495_v11 = vld [vmem:[%s2240_s4] sm:$0xff]  ;;  %vm412_vm3 = vcmask 7168   ;;  %vm548_vm4 = vcmask 1043456  }
  0x19   : > { %s353_s21 = scalar_lea.vmem %s2248_s0, %s1436_s12  ;;  %v468_v12 = vsel %vm385_vm0, %v1495_v11, 0  ;;  %s360_s26 = scalar_lea.vmem %s2237_s1, %s1436_s12  ;;  %v1584_v14 = vld [vmem:[%s2239_s3] ss:$0 sm:$0xff]  ;;  %v1717_v32 = vmov -inf   ;;  %vm515_vm5 = vcmask 64512   ;;  %v1718_v40 = vmov 0  }
  0x1a   : > { %v366_v9 = vld [vmem:[%s353_s21] sm:$0xf]  ;;  %s1715_s12 = smov 124   ;;  %413 = vst.msk [vmem:[#allocation3] sm:$0xff] %vm412_vm3, %v1717_v32  ;;  %1581 = vset.pattern.permute.xlu0 %v1718_v40  ;;  %1582 = vset.pattern.permute.xlu1 %v1718_v40  ;;  %v1719_v41 = vmov 0.0   ;;  %s1720_s21 = smov 116  }
  0x1b   : > { %v430_v13 = vld [vmem:[%s360_s26] sm:$0xf]  ;;  %414 = vst.msk [vmem:[#allocation3 + $0x8] sm:$0xff] %vm412_vm3, %v1717_v32  ;;  %1583 = vset.pattern.permute.xlu2 %v1718_v40  ;;  %s1725_s26 = smov 92   ;;  %s1726_s11 = smov 120   ;;  %vm661_vm6 = vcmask 64544  }
  0x1c   : > { %v1585_v20 = vld [vmem:[%s2241_s5] ss:$0 sm:$0xff]  ;;  %415 = vst.msk [vmem:[#allocation3 + $0x10] sm:$0xff] %vm412_vm3, %v1717_v32  ;;  %vm750_vm7 = vcmask 97344   ;;  %vm839_vm8 = vcmask 130144   ;;  %vm928_vm9 = vcmask 162944  }
  0x1d   : > { %416 = vst.msk [vmem:[#allocation3 + $0x18] sm:$0xff] %vm412_vm3, %v1717_v32  ;;  %vm1017_vm10 = vcmask 195744   ;;  %vm1106_vm11 = vcmask 228544   ;;  %vm1195_vm12 = vcmask 261344  }
  0x1e   : > { %417 = vst.msk [vmem:[#allocation3 + $0x20] sm:$0xff] %vm412_vm3, %v1717_v32 }
  0x1f   : > { %418 = vst.msk [vmem:[#allocation3 + $0x28] sm:$0xff] %vm412_vm3, %v1717_v32 }
  0x20   : > { %484 = vmatpush.bf16.xpose.msra.mxu1 %v474_v6  ;;  %402 = vmatpush.bf16.xpose.msra.mxu0 %v390_v7  ;;  %419 = vst.msk [vmem:[#allocation3 + $0x30] sm:$0xff] %vm412_vm3, %v1717_v32 }
  0x21   : > { %420 = vst.msk [vmem:[#allocation3 + $0x38] sm:$0xff] %vm412_vm3, %v1717_v32  ;;  %v1906_v42 = vld [vmem:[#allocation3] sm:$0xff] }
  0x22   : > { %422 = vst.msk [vmem:[#allocation4 + $0x8] sm:$0xff] %vm412_vm3, %v1719_v41  ;;  %v1930_v5 = vld [vmem:[#allocation3 + $0x8] sm:$0xff] }
  0x23   : > { %421 = vst.msk [vmem:[#allocation4] sm:$0xff] %vm412_vm3, %v1719_v41 }
  0x24   : > { %423 = vst.msk [vmem:[#allocation4 + $0x10] sm:$0xff] %vm412_vm3, %v1719_v41 }
  0x25   : > { %424 = vst.msk [vmem:[#allocation4 + $0x18] sm:$0xff] %vm412_vm3, %v1719_v41 }
  0x26   : > { %425 = vst.msk [vmem:[#allocation4 + $0x20] sm:$0xff] %vm412_vm3, %v1719_v41 }
  0x27   : > { %1446 = vmatmul.msk.bf16.vlgmr.msra.gmra.mxu0 %vm385_vm0, %v366_v9  ;;  %426 = vst.msk [vmem:[#allocation4 + $0x28] sm:$0xff] %vm412_vm3, %v1719_v41 }
  0x28   : > { %485 = vmatpush.bf16.xpose.msra.mxu1 %v471_v10  ;;  %427 = vst.msk [vmem:[#allocation4 + $0x30] sm:$0xff] %vm412_vm3, %v1719_v41 }
  0x29   : > { %428 = vst.msk [vmem:[#allocation4 + $0x38] sm:$0xff] %vm412_vm3, %v1719_v41 }
  0x2a   : > { %429 = vst.msk [vmem:[#allocation5] sm:$0xff] %vm385_vm0, %v1719_v41 }
  0x30   : > { %486 = vmatpush.bf16.xpose.msra.mxu1 %v468_v12 }
  0x37   : > { %1463 = vmatmul.msk.bf16.vlgmr.msra.gmra.mxu1 %vm385_vm0, %v430_v13 }
  0xa4   : > { %v404_v15 = vpop.f32.mrf.mxu0 }
  0xa5   : > { %v405_v16 = vadd.f32 %v1584_v14, %v404_v15 }
  0xa7   : > { %v408_v17 = vmul.f32 0.5, %v405_v16 }
  0xa9   : > { %v409_v18 = vpack.c.bf16 %v408_v17, %v408_v17 }
  0xab   : > { %411 = vst.msk [vmem:[#allocation2] sm:$0xf] %vm410_vm1, %v409_v18 }
  0xac   : > { %v406_v19 = vpop.f32.mrf.mxu0 }
  0xb2   : > { %v575_v21 = vld [vmem:[#allocation2] sm:$0xf] }
  0xb3   : > { %v577_v22 = vunpack.c.l.b16 %v575_v21  ;;  %v493_v31 = vld [vmem:[#allocation2] sm:$0xf] }
  0xb4   : > { %v488_v23 = vpop.f32.mrf.mxu1  ;;  %v842_v46 = vld [vmem:[#allocation2] sm:$0xf] }
  0xb5   : > { %v489_v24 = vadd.f32 %v1585_v20, %v488_v23  ;;  %v578_v25 = vpack.c.b16 %v577_v22, %v577_v22  ;;  %v844_v47 = vunpack.c.l.b16 %v842_v46  ;;  %v931_v49 = vld [vmem:[#allocation2] sm:$0xf] }
  0xb6   : > { %v933_v50 = vunpack.c.l.b16 %v931_v49  ;;  %v1020_v52 = vld [vmem:[#allocation2] sm:$0xf] }
  0xb7   : > { %v492_v26 = vpack.c.bf16 %v489_v24, %v489_v24  ;;  %579 = vrot.lane.b32.xlu2 %v578_v25, %s1715_s12  ;;  %v845_v48 = vpack.c.b16 %v844_v47, %v844_v47  ;;  %v1022_v53 = vunpack.c.l.b16 %v1020_v52  ;;  %v1109_v2 = vld [vmem:[#allocation2] sm:$0xf]  ;;  %v1970_v47 = vld [vmem:[#allocation3 + $0x20] sm:$0xff] }
  0xb8   : > { %v934_v51 = vpack.c.b16 %v933_v50, %v933_v50  ;;  %v1111_v3 = vunpack.c.l.b16 %v1109_v2  ;;  %v664_v13 = vld [vmem:[#allocation2] sm:$0xf] }
  0xb9   : > { %v541_v27 = vunpack.c.l.b16 %v492_v26  ;;  %v499_v28 = vsel %vm494_vm2, %v492_v26, 0  ;;  %v1023_v54 = vpack.c.b16 %v1022_v53, %v1022_v53  ;;  %v666_v14 = vunpack.c.l.b16 %v664_v13  ;;  %v753_v16 = vld [vmem:[#allocation2] sm:$0xf] }
  0xba   : > { %508 = vmatpush.bf16.xpose.msra.mxu2 %v499_v28  ;;  %v1112_v4 = vpack.c.b16 %v1111_v3, %v1111_v3  ;;  %v755_v17 = vunpack.c.l.b16 %v753_v16 }
  0xbb   : > { %v1881_v29 = vpack.c.b16 %v541_v27, %v541_v27  ;;  %v667_v15 = vpack.c.b16 %v666_v14, %v666_v14 }
  0xbc   : > { %v490_v30 = vpop.f32.mrf.mxu1  ;;  %v756_v18 = vpack.c.b16 %v755_v17, %v755_v17 }
  0xbd   : > { %543 = vrot.lane.b32.xlu1 %v1881_v29, %s1716_s20  ;;  %s1731_s20 = smov 68  }
  0xc1   : > { %1464 = vmatmul.msk.bf16.vlgmr.msra.gmra.mxu2 %vm494_vm2, %v493_v31 }
  0xc5   : > { %581 = vrot.lane.b32.xlu1 %v1881_v29, %s1715_s12  ;;  %s1730_s12 = smov 72  }
 0x111   : > { %v580_v60 = vpop.permute.xlu2 %579 }
 0x12f   : > { %v544_v33 = vpop.permute.xlu1 %543 }
 0x130   : > { %v550_v34 = vsel %vm548_vm4, %v544_v33, 0 }
 0x131   : > { %559 = vmatpush.bf16.msra.mxu3 %v550_v34 }
 0x137   : > { %v582_v35 = vpop.permute.xlu1 %581 }
 0x138   : > { %v587_v36 = vsel %vm494_vm2, %v582_v35, 0 }
 0x139   : > { %596 = vmatpush.bf16.xpose.msrb.mxu3 %v587_v36 }
 0x144   : > { %v510_v37 = vpop.f32.mrf.mxu2 }
 0x145   : > { %v516_v38 = vsel %vm515_vm5, %v510_v37, -inf }
 0x146   : > { %517 = vmax.xlane.f32.xlu0 %v516_v38 }
 0x14c   : > { %v512_v39 = vpop.f32.mrf.mxu2 }
 0x1b9   : > { %v518_v43 = vpop.xlane.xlu0 %517 }
 0x1ba   : > { %v1909_v44 = vmax.f32 %v1906_v42, %v518_v43 }
 0x1bc   : > { %v520_v45 = vsub.f32 %v1906_v42, %v1909_v44  ;;  %574 = vst.msk [vmem:[#allocation3] sm:$0xff] %vm412_vm3, %v1909_v44  ;;  %525 = vperm.xlu0 %1581, %v1909_v44  }
 0x1c4   : > { %759 = vrot.lane.b32.xlu0 %v1881_v29, %s1720_s21 }
 0x1cc   : > { %846 = vrot.lane.b32.xlu0 %v845_v48, %s1721_s22 }
 0x1d4   : > { %935 = vrot.lane.b32.xlu0 %v934_v51, %s1722_s23 }
 0x1dc   : > { %1024 = vrot.lane.b32.xlu0 %v1023_v54, %s1723_s24 }
 0x22e   : > { %v526_v55 = vpop.permute.xlu0 %525 }
 0x22f   : > { %v528_v56 = vsub.f32 %v510_v37, %v526_v55 }
 0x231   : > { %v529_v57 = vmul.f32 1.442695, %v528_v56 }
 0x233   : > { %1587 = vpow2.f32 %v529_v57 }
 0x236   : > { %v760_v9 = vpop.permute.xlu0 %759 }
 0x237   : > { %v765_v24 = vsel %vm494_vm2, %v760_v9, 0 }
 0x239   : > { %v1920_v58 = vpop.eup %1587 }
 0x23a   : > { %v539_v59 = vpack.c.bf16 %v1920_v58, %v1920_v58 }
 0x23c   : > { %1465 = vmatmul.msk.bf16.vlgmr.msra.gmra.mxu3 %vm515_vm5, %v539_v59 }
 0x23e   : > { %v847_v12 = vpop.permute.xlu0 %846 }
 0x246   : > { %v936_v37 = vpop.permute.xlu0 %935 }
 0x24c   : > { %1466 = vmatmul.msk.bf16.vlgmr.msrb.gmra.mxu3 %vm494_vm2, %v580_v60 }
 0x24e   : > { %v1025_v40 = vpop.permute.xlu0 %1024 }
 0x2bf   : > { %v1926_v61 = vpop.f32.mrf.mxu3 }
 0x2c7   : > { %v563_v62 = vpop.f32.mrf.mxu3 }
 0x2cf   : > { %v598_v63 = vpop.f32.mrf.mxu3 }
 0x2d0   : > { %v604_v0 = vsel %vm515_vm5, %v598_v63, -inf }
 0x2d1   : > { %605 = vmax.xlane.f32.xlu2 %v604_v0 }
 0x2d7   : > { %v600_v1 = vpop.f32.mrf.mxu3 }
 0x2e9   : > { %848 = vrot.lane.b32.xlu2 %v1881_v29, %s1721_s22  ;;  %s1733_s22 = smov 76  }
 0x2f1   : > { %1113 = vrot.lane.b32.xlu2 %v1112_v4, %s1724_s25  ;;  %v1997_v4 = vld [vmem:[#allocation3 + $0x10] sm:$0xff] }
 0x344   : > { %v606_v6 = vpop.xlane.xlu2 %605 }
 0x345   : > { %v1933_v7 = vmax.f32 %v1930_v5, %v606_v6 }
 0x347   : > { %v608_v8 = vsub.f32 %v1930_v5, %v1933_v7  ;;  %663 = vst.msk [vmem:[#allocation3 + $0x8] sm:$0xff] %vm412_vm3, %v1933_v7  ;;  %613 = vperm.xlu1 %1582, %v1933_v7  }
 0x34c   : > { %v849_v10 = vpop.permute.xlu2 %848 }
 0x34d   : > { %v854_v11 = vsel %vm494_vm2, %v849_v10, 0 }
 0x34e   : > { %863 = vmatpush.bf16.xpose.msrb.mxu1 %v854_v11  ;;  %v2008_v11 = vld [vmem:[#allocation3 + $0x18] sm:$0xff] }
 0x34f   : > { %628 = vrot.lane.b32.xlu1 %v1881_v29, %s1725_s26  ;;  %s1737_s26 = smov 20  }
 0x354   : > { %v1114_v46 = vpop.permute.xlu2 %1113 }
 0x355   : > { %1472 = vmatmul.msk.bf16.vlgmr.msrb.gmra.mxu1 %vm494_vm2, %v847_v12 }
 0x357   : > { %670 = vrot.lane.b32.xlu1 %v1881_v29, %s1726_s11 }
 0x35f   : > { %668 = vrot.lane.b32.xlu1 %v667_v15, %s1726_s11  ;;  %v2019_v15 = vld [vmem:[#allocation3 + $0x30] sm:$0xff]  ;;  %s1738_s11 = smov 12  }
 0x367   : > { %757 = vrot.lane.b32.xlu1 %v756_v18, %s1720_s21  ;;  %s1732_s21 = smov 4  }
 0x36f   : > { %937 = vrot.lane.b32.xlu1 %v1881_v29, %s1722_s23  ;;  %s1734_s23 = smov 8  }
 0x377   : > { %1026 = vrot.lane.b32.xlu1 %v1881_v29, %s1723_s24  ;;  %s1735_s24 = smov 16  }
 0x37f   : > { %1115 = vrot.lane.b32.xlu1 %v1881_v29, %s1724_s25  ;;  %s1736_s25 = smov 24  }
 0x3b9   : > { %v614_v19 = vpop.permute.xlu1 %613 }
 0x3ba   : > { %v616_v20 = vsub.f32 %v598_v63, %v614_v19 }
 0x3bc   : > { %v617_v21 = vmul.f32 1.442695, %v616_v20 }
 0x3be   : > { %1589 = vpow2.f32 %v617_v21 }
 0x3c1   : > { %v629_v22 = vpop.permute.xlu1 %628 }
 0x3c2   : > { %v634_v23 = vsel %vm548_vm4, %v629_v22, 0  ;;  %v2034_v22 = vld [vmem:[#allocation3 + $0x28] sm:$0xff] }
 0x3c3   : > { %643 = vmatpush.bf16.msrb.mxu2 %v634_v23 }
 0x3c4   : > { %v1952_v25 = vpop.eup %1589 }
 0x3c5   : > { %v627_v26 = vpack.c.bf16 %v1952_v25, %v1952_v25 }
 0x3c7   : > { %774 = vmatpush.bf16.xpose.msra.mxu2 %v765_v24 }
 0x3c8   : > { %1467 = vmatmul.msk.bf16.vlgmr.msrb.gmra.mxu2 %vm515_vm5, %v627_v26 }
 0x3c9   : > { %v671_v27 = vpop.permute.xlu1 %670 }
 0x3ca   : > { %v676_v28 = vsel %vm494_vm2, %v671_v27, 0 }
 0x3cb   : > { %685 = vmatpush.bf16.xpose.msrb.mxu0 %v676_v28 }
 0x3d1   : > { %v669_v30 = vpop.permute.xlu1 %668 }
 0x3d2   : > { %1468 = vmatmul.msk.bf16.vlgmr.msrb.gmra.mxu0 %vm494_vm2, %v669_v30  ;;  %v1959_v31 = vpop.f32.mrf.mxu1 }
 0x3d3   : > { %v871_v32 = vsel %vm515_vm5, %v1959_v31, -inf }
 0x3d4   : > { %872 = vmax.xlane.f32.xlu2 %v871_v32 }
 0x3d9   : > { %v758_v33 = vpop.permute.xlu1 %757 }
 0x3da   : > { %1470 = vmatmul.msk.bf16.vlgmr.msra.gmra.mxu2 %vm494_vm2, %v758_v33  ;;  %v867_v34 = vpop.f32.mrf.mxu1 }
 0x3db   : > { %v622_v34 = vsel %vm515_vm5, %v1952_v25, 0.0 }
 0x3e1   : > { %v938_v35 = vpop.permute.xlu1 %937 }
 0x3e2   : > { %v943_v36 = vsel %vm494_vm2, %v938_v35, 0 }
 0x3e3   : > { %952 = vmatpush.bf16.xpose.msrb.mxu2 %v943_v36 }
 0x3e9   : > { %v1027_v38 = vpop.permute.xlu1 %1026 }
 0x3ea   : > { %v1032_v39 = vsel %vm494_vm2, %v1027_v38, 0  ;;  %1474 = vmatmul.msk.bf16.vlgmr.msrb.gmra.mxu2 %vm494_vm2, %v936_v37 }
 0x3eb   : > { %1041 = vmatpush.bf16.xpose.msra.mxu1 %v1032_v39 }
 0x3f1   : > { %v1116_v41 = vpop.permute.xlu1 %1115 }
 0x3f2   : > { %v1121_v43 = vsel %vm494_vm2, %v1116_v41, 0  ;;  %1476 = vmatmul.msk.bf16.vlgmr.msra.gmra.mxu1 %vm494_vm2, %v1025_v40 }
 0x3f3   : > { %1130 = vmatpush.bf16.xpose.msra.mxu2 %v1121_v43 }
 0x3fa   : > { %1478 = vmatmul.msk.bf16.vlgmr.msra.gmra.mxu2 %vm494_vm2, %v1114_v46 }
 0x447   : > { %v873_v48 = vpop.xlane.xlu2 %872 }
 0x448   : > { %v1973_v49 = vmax.f32 %v1970_v47, %v873_v48 }
 0x44a   : > { %930 = vst.msk [vmem:[#allocation3 + $0x20] sm:$0xff] %vm412_vm3, %v1973_v49 }
 0x44b   : > { %v645_v50 = vpop.f32.mrf.mxu2 }
 0x44f   : > { %v1977_v51 = vpop.f32.mrf.mxu0 }
 0x450   : > { %v693_v52 = vsel %vm515_vm5, %v1977_v51, -inf }
 0x451   : > { %694 = vmax.xlane.f32.xlu0 %v693_v52 }
 0x453   : > { %v647_v53 = vpop.f32.mrf.mxu2 }
 0x457   : > { %v689_v54 = vpop.f32.mrf.mxu0 }
 0x45d   : > { %v1981_v55 = vpop.f32.mrf.mxu2 }
 0x45e   : > { %v782_v56 = vsel %vm515_vm5, %v1981_v55, -inf }
 0x45f   : > { %783 = vmax.xlane.f32.xlu1 %v782_v56 }
 0x465   : > { %v778_v57 = vpop.f32.mrf.mxu2 }
 0x46d   : > { %v1985_v59 = vpop.f32.mrf.mxu2 }
 0x46e   : > { %v960_v3 = vsel %vm515_vm5, %v1985_v59, -inf }
 0x46f   : > { %v1987_v60 = vpop.f32.mrf.mxu1 }
 0x470   : > { %v1049_v62 = vsel %vm515_vm5, %v1987_v60, -inf }
 0x471   : > { %1050 = vmax.xlane.f32.xlu2 %v1049_v62  ;;  %v2074_v62 = vld [vmem:[#allocation3 + $0x38] sm:$0xff] }
 0x475   : > { %v956_v63 = vpop.f32.mrf.mxu2 }
 0x476   : > { %v521_v63 = vmul.f32 1.442695, %v520_v45 }
 0x477   : > { %v1045_v0 = vpop.f32.mrf.mxu1 }
 0x478   : > { %717 = vrot.lane.b32.xlu1 %v1881_v29, %s1727_s14  ;;  %s1739_s14 = smov 28  }
 0x47d   : > { %v1992_v1 = vpop.f32.mrf.mxu2 }
 0x47e   : > { %v1138_v21 = vsel %vm515_vm5, %v1992_v1, -inf }
 0x485   : > { %v1134_v2 = vpop.f32.mrf.mxu2 }
 0x4a2   : > { %961 = vmax.xlane.f32.xlu1 %v960_v3 }
 0x4bb   : > { %895 = vrot.lane.b32.xlu1 %v1881_v29, %s1728_s16 }
 0x4c4   : > { %v695_v6 = vpop.xlane.xlu0 %694 }
 0x4c5   : > { %v2000_v9 = vmax.f32 %v1997_v4, %v695_v6 }
 0x4c7   : > { %v697_v10 = vsub.f32 %v1997_v4, %v2000_v9  ;;  %752 = vst.msk [vmem:[#allocation3 + $0x10] sm:$0xff] %vm412_vm3, %v2000_v9  ;;  %702 = vperm.xlu0 %1581, %v2000_v9  }
 0x4c9   : > { %v698_v42 = vmul.f32 1.442695, %v697_v10 }
 0x4cf   : > { %880 = vperm.xlu0 %1581, %v1973_v49  }
 0x4d2   : > { %v784_v12 = vpop.xlane.xlu1 %783 }
 0x4d3   : > { %v2011_v13 = vmax.f32 %v2008_v11, %v784_v12 }
 0x4d5   : > { %v786_v14 = vsub.f32 %v2008_v11, %v2011_v13  ;;  %841 = vst.msk [vmem:[#allocation3 + $0x18] sm:$0xff] %vm412_vm3, %v2011_v13  ;;  %791 = vperm.xlu2 %1583, %v2011_v13   ;;  %v609_v11 = vmul.f32 1.442695, %v608_v8 }
 0x4dd   : > { %806 = vrot.lane.b32.xlu2 %v1881_v29, %s1729_s19 }
 0x4e4   : > { %v1051_v16 = vpop.xlane.xlu2 %1050 }
 0x4e5   : > { %v2022_v17 = vmax.f32 %v2019_v15, %v1051_v16 }
 0x4e7   : > { %v1053_v18 = vsub.f32 %v2019_v15, %v2022_v17  ;;  %1108 = vst.msk [vmem:[#allocation3 + $0x30] sm:$0xff] %vm412_vm3, %v2022_v17  ;;  %1058 = vperm.xlu1 %1582, %v2022_v17  }
 0x4ea   : > { %v718_v19 = vpop.permute.xlu1 %717 }
 0x4eb   : > { %v723_v20 = vsel %vm548_vm4, %v718_v19, 0 }
 0x4ec   : > { %732 = vmatpush.bf16.msra.mxu3 %v723_v20  ;;  %v787_v20 = vmul.f32 1.442695, %v786_v14 }
 0x4ef   : > { %1073 = vrot.lane.b32.xlu1 %v1881_v29, %s1730_s12 }
 0x4f7   : > { %1162 = vrot.lane.b32.xlu1 %v1881_v29, %s1731_s20 }
 0x4f9   : > { %1139 = vmax.xlane.f32.xlu0 %v1138_v21 }
 0x50d   : > { %657 = vrot.lane.b32.xlu0 %v645_v50, %s1732_s21  ;;  %s344_s21 = sand.u32 1, %s1697_s28  }
 0x515   : > { %v962_v23 = vpop.xlane.xlu1 %961 }
 0x516   : > { %v2037_v24 = vmax.f32 %v2034_v22, %v962_v23  ;;  %v620_v23 = vld [vmem:[#allocation4 + $0x8] sm:$0xff] }
 0x518   : > { %v964_v26 = vsub.f32 %v2034_v22, %v2037_v24  ;;  %1019 = vst.msk [vmem:[#allocation3 + $0x28] sm:$0xff] %vm412_vm3, %v2037_v24  ;;  %969 = vperm.xlu2 %1583, %v2037_v24  }
 0x51a   : > { %v965_v5 = vmul.f32 1.442695, %v964_v26 }
 0x520   : > { %984 = vrot.lane.b32.xlu2 %v1881_v29, %s1733_s22  ;;  %s1490_s22 = sshll.u32 %s1705_s30, 3  ;;  %s1325_s30 = scalar_lea.sflag [#allocation7], %s344_s21 }
 0x52d   : > { %v896_v27 = vpop.permute.xlu1 %895 }
 0x52e   : > { %v901_v28 = vsel %vm548_vm4, %v896_v27, 0 }
 0x52f   : > { %v792_v30 = vpop.permute.xlu2 %791  ;;  %910 = vmatpush.bf16.msrb.mxu3 %v901_v28 }
 0x530   : > { %v794_v32 = vsub.f32 %v1981_v55, %v792_v30 }
 0x532   : > { %v795_v33 = vmul.f32 1.442695, %v794_v32  ;;  %v533_v32 = vsel %vm515_vm5, %v1920_v58, 0.0  ;;  %v565_v58 = vld [vmem:[#allocation5] sm:$0xff] }
 0x534   : > { %1591 = vpow2.f32 %v795_v33 }
 0x537   : > { %v807_v35 = vpop.permute.xlu2 %806  ;;  %623 = vadd.xlane.f32.xlu0 %v622_v34 }
 0x538   : > { %v812_v36 = vsel %vm548_vm4, %v807_v35, 0 }
 0x539   : > { %v703_v37 = vpop.permute.xlu0 %702  ;;  %821 = vmatpush.bf16.msra.mxu0 %v812_v36 }
 0x53a   : > { %v2050_v38 = vpop.eup %1591  ;;  %v705_v29 = vsub.f32 %v1977_v51, %v703_v37 }
 0x53b   : > { %v805_v39 = vpack.c.bf16 %v2050_v38, %v2050_v38 }
 0x53c   : > { %v706_v40 = vmul.f32 1.442695, %v705_v29 }
 0x53d   : > { %1471 = vmatmul.msk.bf16.vlgmr.msra.gmra.mxu0 %vm515_vm5, %v805_v39 }
 0x53e   : > { %1593 = vpow2.f32 %v706_v40 }
 0x541   : > { %v881_v41 = vpop.permute.xlu0 %880 }
 0x542   : > { %v883_v25 = vsub.f32 %v1959_v31, %v881_v41 }
 0x544   : > { %v2056_v43 = vpop.eup %1593  ;;  %v884_v48 = vmul.f32 1.442695, %v883_v25 }
 0x545   : > { %v716_v46 = vpack.c.bf16 %v2056_v43, %v2056_v43 }
 0x546   : > { %1595 = vpow2.f32 %v884_v48  ;;  %v1054_v48 = vmul.f32 1.442695, %v1053_v18  ;;  %v875_v18 = vsub.f32 %v1970_v47, %v1973_v49 }
 0x547   : > { %1469 = vmatmul.msk.bf16.vlgmr.msra.gmra.mxu3 %vm515_vm5, %v716_v46 }
 0x54c   : > { %v2062_v50 = vpop.eup %1595 }
 0x54d   : > { %v894_v51 = vpack.c.bf16 %v2062_v50, %v2062_v50 }
 0x557   : > { %1473 = vmatmul.msk.bf16.vlgmr.msrb.gmra.mxu3 %vm515_vm5, %v894_v51 }
 0x559   : > { %v1059_v52 = vpop.permute.xlu1 %1058 }
 0x55a   : > { %v1061_v53 = vsub.f32 %v1987_v60, %v1059_v52  ;;  %v711_v52 = vsel %vm515_vm5, %v2056_v43, 0.0  ;;  %v531_v43 = vld [vmem:[#allocation4] sm:$0xff] }
 0x55c   : > { %v1062_v54 = vmul.f32 1.442695, %v1061_v53 }
 0x55e   : > { %1597 = vpow2.f32 %v1062_v54 }
 0x55f   : > { %1599 = vpow2.f32 %v521_v63 }
 0x561   : > { %v1074_v31 = vpop.permute.xlu1 %1073 }
 0x562   : > { %v1079_v55 = vsel %vm548_vm4, %v1074_v31, 0  ;;  %v876_v31 = vmul.f32 1.442695, %v875_v18 }
 0x563   : > { %1088 = vmatpush.bf16.msra.mxu3 %v1079_v55 }
 0x564   : > { %v2069_v56 = vpop.eup %1597 }
 0x565   : > { %v1072_v57 = vpack.c.bf16 %v2069_v56, %v2069_v56  ;;  %v2091_v45 = vpop.eup %1599 }
 0x567   : > { %1477 = vmatmul.msk.bf16.vlgmr.msra.gmra.mxu3 %vm515_vm5, %v1072_v57  ;;  %v532_v57 = vmul.f32 %v2091_v45, %v531_v43 }
 0x569   : > { %v1163_v12 = vpop.permute.xlu1 %1162 }
 0x56c   : > { %v1140_v60 = vpop.xlane.xlu0 %1139 }
 0x56d   : > { %v2080_v0 = vmax.f32 %v2074_v62, %v1140_v60 }
 0x56f   : > { %v1142_v2 = vsub.f32 %v2074_v62, %v2080_v0  ;;  %1197 = vst.msk [vmem:[#allocation3 + $0x38] sm:$0xff] %vm412_vm3, %v2080_v0  ;;  %1147 = vperm.xlu2 %1583, %v2080_v0  }
 0x572   : > { %v970_v3 = vpop.permute.xlu2 %969 }
 0x573   : > { %v972_v6 = vsub.f32 %v1985_v59, %v970_v3  ;;  %v1168_v59 = vsel %vm548_vm4, %v1163_v12, 0 }
 0x575   : > { %v973_v44 = vmul.f32 1.442695, %v972_v6 }
 0x577   : > { %1601 = vpow2.f32 %v973_v44  ;;  %568 = vperm.xlu2 %1583, %v2091_v45  }
 0x578   : > { %1603 = vpow2.f32 %v698_v42  ;;  %v889_v42 = vsel %vm515_vm5, %v2062_v50, 0.0 }
 0x579   : > { %1605 = vpow2.f32 %v787_v20 }
 0x57a   : > { %v985_v16 = vpop.permute.xlu2 %984  ;;  %1607 = vpow2.f32 %v609_v11 }
 0x57b   : > { %v990_v19 = vsel %vm548_vm4, %v985_v16, 0  ;;  %1609 = vpow2.f32 %v965_v5  ;;  %v709_v16 = vld [vmem:[#allocation4 + $0x10] sm:$0xff] }
 0x57c   : > { %999 = vmatpush.bf16.msrb.mxu0 %v990_v19 }
 0x57d   : > { %v2099_v4 = vpop.eup %1601 }
 0x57e   : > { %v2101_v9 = vpop.eup %1603  ;;  %v983_v10 = vpack.c.bf16 %v2099_v4, %v2099_v4  ;;  %v978_v44 = vsel %vm515_vm5, %v2099_v4, 0.0 }
 0x57f   : > { %741 = vperm.xlu2 %1583, %v2101_v9   ;;  %v2107_v21 = vpop.eup %1605  ;;  %v2113_v13 = vpop.permute.xlu0 %657  ;;  %v710_v19 = vmul.f32 %v2101_v9, %v709_v16 }
 0x580   : > { %1177 = vmatpush.bf16.msra.mxu0 %v1168_v59  ;;  %v1608_v14 = vpop.eup %1607 }
 0x581   : > { %1475 = vmatmul.msk.bf16.vlgmr.msrb.gmra.mxu0 %vm515_vm5, %v983_v10  ;;  %v621_v27 = vmul.f32 %v1608_v14, %v620_v23  ;;  %v2121_v8 = vpop.eup %1609  ;;  %v1067_v10 = vsel %vm515_vm5, %v2069_v56, 0.0 }
 0x587   : > { %830 = vperm.xlu2 %1583, %v2107_v21  }
 0x5aa   : > { %v624_v28 = vpop.xlane.xlu0 %623 }
 0x5ab   : > { %v625_v30 = vadd.f32 %v624_v28, %v621_v27 }
 0x5ad   : > { %626 = vst.msk [vmem:[#allocation4 + $0x8] sm:$0xff] %vm412_vm3, %v625_v30 }
 0x5b0   : > { %534 = vadd.xlane.f32.xlu2 %v533_v32 }
 0x5b4   : > { %v1211_v20 = vld [vmem:[#allocation4 + $0x8] sm:$0xff] }
 0x5ba   : > { %v823_v33 = vpop.f32.mrf.mxu0 }
 0x5c2   : > { %v825_v7 = vpop.f32.mrf.mxu0 }
 0x5c8   : > { %1008 = vperm.xlu2 %1583, %v2121_v8  }
 0x5c9   : > { %v1148_v34 = vpop.permute.xlu2 %1147 }
 0x5ca   : > { %v1150_v35 = vsub.f32 %v1992_v1, %v1148_v34  ;;  %v734_v36 = vpop.f32.mrf.mxu3 }
 0x5cb   : > { %746 = vrot.lane.b32.xlu1 %v734_v36, %s1734_s23  ;;  %s1435_s23 = sshll.u32 %s344_s21, 3 }
 0x5cc   : > { %v1151_v37 = vmul.f32 1.442695, %v1150_v35  ;;  %s346_s16 = scalar_lea.vmem [#allocation6], %s1435_s23  ;;  %s1655_s23 = scalar_lea.hbm %s2244_s8, 16 }
 0x5cd   : > { %s1338_s19 = sshll.u32 %s346_s16, 4  ;;  %s1339_s19 = int_to_ptr.vmem [resolvable:$true] %s1338_s19 }
 0x5ce   : > { %1611 = vpow2.f32 %v1151_v37 }
 0x5cf   : > { %1613 = vpow2.f32 %v1054_v48 }
 0x5d1   : > { %v569_v29 = vpop.permute.xlu2 %568 }
 0x5d2   : > { %v571_v39 = vmul.f32 %v569_v29, %v565_v58  ;;  %v736_v40 = vpop.f32.mrf.mxu3 }
 0x5d4   : > { %v1612_v22 = vpop.eup %1611  ;;  %v572_v24 = vadd.f32 %v571_v39, %v1926_v61  ;;  %v1143_v61 = vmul.f32 1.442695, %v1142_v2  ;;  %v800_v2 = vsel %vm515_vm5, %v2050_v38, 0.0 }
 0x5d5   : > { %v1161_v26 = vpack.c.bf16 %v1612_v22, %v1612_v22  ;;  %v2136_v53 = vpop.eup %1613  ;;  %v1156_v6 = vsel %vm515_vm5, %v1612_v22, 0.0 }
 0x5d6   : > { %573 = vst.msk [vmem:[#allocation5] sm:$0xff] %vm494_vm2, %v572_v24  ;;  %1615 = vpow2.f32 %v1143_v61 }
 0x5d7   : > { %1479 = vmatmul.msk.bf16.vlgmr.msra.gmra.mxu0 %vm515_vm5, %v1161_v26  ;;  %1617 = vpow2.f32 %v876_v31  ;;  %v798_v26 = vld [vmem:[#allocation4 + $0x18] sm:$0xff] }
 0x5d9   : > { %v742_v17 = vpop.permute.xlu2 %741 }
 0x5da   : > { %v912_v41 = vpop.f32.mrf.mxu3 }
 0x5db   : > { %924 = vrot.lane.b32.xlu1 %v912_v41, %s1735_s24 }
 0x5dc   : > { %v2139_v15 = vpop.eup %1615 }
 0x5dd   : > { %v2145_v60 = vpop.eup %1617  ;;  %v649_v23 = vld [vmem:[#allocation5] sm:$0xff] }
 0x5e1   : > { %v831_v55 = vpop.permute.xlu2 %830 }
 0x5e2   : > { %v914_v1 = vpop.f32.mrf.mxu3 }
 0x5e3   : > { %v799_v1 = vmul.f32 %v2107_v21, %v798_v26 }
 0x5ea   : > { %v1090_v25 = vpop.f32.mrf.mxu3 }
 0x5eb   : > { %1102 = vrot.lane.b32.xlu2 %v1090_v25, %s1736_s25 }
 0x5f2   : > { %v1092_v46 = vpop.f32.mrf.mxu3 }
 0x5fe   : > { %v1001_v51 = vpop.f32.mrf.mxu0 }
 0x5ff   : > { %1013 = vrot.lane.b32.xlu0 %v1001_v51, %s1737_s26  ;;  %s1336_s26 = scalar_lea.hbm %s2244_s8, %s1490_s22 }
 0x600   : > { %s1340_s12 = sshll.u32 %s1336_s26, 4  ;;  %s1341_s12 = int_to_ptr.hbm [resolvable:$true] %s1340_s12 }
 0x601   : > { %s1649_s20 = sshra.s32 %s1341_s12, 4  ;;  %s1650_s20 = int_to_ptr.hbm [resolvable:$true] %s1649_s20 }
 0x602   : > { %s1651_s0 = scalar_lea.hbm %s1650_s20, 8  ;;  %p1656_p1 = scmp.lt.s32.totalorder %s1650_s20, %s2244_s8 }
 0x603   : > { %p1652_p12 = scmp.ne.s32.totalorder %s1650_s20, %s1651_s0  ;;  %p1657_p2 = scmp.lt.s32.totalorder %s1655_s23, %s1651_s0 }
 0x605   : > { %712 = vadd.xlane.f32.xlu1 %v711_v52  ;;  %v1154_v52 = vld [vmem:[#allocation4 + $0x38] sm:$0xff]  ;;  %p1653_p13 = pnand %p1652_p12, %p1825_p4  ;;  %p1658_p3 = por %p1657_p2, %p1656_p1 }
 0x606   : > { %v1003_v54 = vpop.f32.mrf.mxu0  ;;  %v1155_v18 = vmul.f32 %v2139_v15, %v1154_v52 }
 0x607   : > { %1097 = vperm.xlu0 %1581, %v2136_v53   ;;  %p1654_p0 = pneg %p1653_p13 }
 0x609   : > { %p1659_p5 = pnand %p1658_p3, %p1654_p0 }
 0x60f   : > { %1186 = vperm.xlu0 %1581, %v2139_v15  }
 0x61e   : > { %652 = vperm.xlu1 %1582, %v1608_v14  }
 0x623   : > { %v535_v62 = vpop.xlane.xlu2 %534 }
 0x624   : > { %v536_v63 = vadd.f32 %v535_v62, %v532_v57 }
 0x626   : > { %538 = vst.msk [vmem:[#allocation4] sm:$0xff] %vm412_vm3, %v536_v63  ;;  %919 = vperm.xlu1 %1582, %v2145_v60   ;;  %v976_v63 = vld [vmem:[#allocation4 + $0x28] sm:$0xff] }
 0x62b   : > { %v1009_v29 = vpop.permute.xlu2 %1008 }
 0x62d   : > { %v1201_v0 = vld [vmem:[#allocation4] sm:$0xff] }
 0x62e   : > { %835 = vrot.lane.b32.xlu1 %v823_v33, %s1738_s11  ;;  %1619 = vrcp.f32 %v1201_v0 }
 0x62f   : > { %1621 = vrcp.f32 %v1211_v20  ;;  %v1065_v20 = vld [vmem:[#allocation4 + $0x30] sm:$0xff] }
 0x634   : > { %v1620_v47 = vpop.eup %1619 }
 0x635   : > { %1206 = vperm.xlu0 %1581, %v1620_v47   ;;  %v1622_v50 = vpop.eup %1621 }
 0x63d   : > { %v747_v45 = vpop.permute.xlu1 %746 }
 0x645   : > { %v1103_v61 = vpop.permute.xlu2 %1102 }
 0x64d   : > { %v925_v12 = vpop.permute.xlu1 %924 }
 0x654   : > { %v1179_v49 = vpop.f32.mrf.mxu0 }
 0x655   : > { %1191 = vrot.lane.b32.xlu2 %v1179_v49, %s1739_s14 }
 0x658   : > { %801 = vadd.xlane.f32.xlu1 %v800_v2  ;;  %v977_v2 = vmul.f32 %v2121_v8, %v976_v63 }
 0x65c   : > { %v1181_v3 = vpop.f32.mrf.mxu0 }
 0x65f   : > { %1157 = vadd.xlane.f32.xlu0 %v1156_v6 }
 0x660   : > { %890 = vadd.xlane.f32.xlu1 %v889_v42 }
 0x668   : > { %979 = vadd.xlane.f32.xlu1 %v978_v44 }
 0x671   : > { %v1014_v35 = vpop.permute.xlu0 %1013 }
 0x678   : > { %v713_v38 = vpop.xlane.xlu1 %712 }
 0x679   : > { %v714_v59 = vadd.f32 %v713_v38, %v710_v19  ;;  %v1098_v58 = vpop.permute.xlu0 %1097  ;;  %v1066_v38 = vmul.f32 %v2136_v53, %v1065_v20 }
 0x67b   : > { %715 = vst.msk [vmem:[#allocation4 + $0x10] sm:$0xff] %vm412_vm3, %v714_v59 }
 0x67e   : > { %1068 = vadd.xlane.f32.xlu2 %v1067_v10 }
 0x681   : > { %1216 = vperm.xlu1 %1582, %v1622_v50   ;;  %v1187_v22 = vpop.permute.xlu0 %1186 }
 0x682   : > { %v1221_v11 = vld [vmem:[#allocation4 + $0x10] sm:$0xff] }
 0x683   : > { %1623 = vrcp.f32 %v1221_v11 }
 0x689   : > { %v1624_v4 = vpop.eup %1623 }
 0x68a   : > { %1226 = vperm.xlu1 %1582, %v1624_v4  }
 0x690   : > { %v653_v14 = vpop.permute.xlu1 %652 }
 0x691   : > { %v655_v27 = vmul.f32 %v653_v14, %v649_v23 }
 0x693   : > { %v660_v9 = vadd.f32 %v2113_v13, %v655_v27 }
 0x695   : > { %662 = vst.msk [vmem:[#allocation5] sm:$0xff] %vm661_vm6, %v660_v9 }
 0x698   : > { %v920_v56 = vpop.permute.xlu1 %919 }
 0x69c   : > { %v738_v28 = vld [vmem:[#allocation5] sm:$0xff] }
 0x69d   : > { %v744_v30 = vmul.f32 %v742_v17, %v738_v28  ;;  %v887_v17 = vld [vmem:[#allocation4 + $0x20] sm:$0xff] }
 0x69f   : > { %v749_v32 = vadd.f32 %v747_v45, %v744_v30 }
 0x6a0   : > { %v836_v7 = vpop.permute.xlu1 %835 }
 0x6a1   : > { %751 = vst.msk [vmem:[#allocation5] sm:$0xff] %vm750_vm7, %v749_v32 }
 0x6a7   : > { %v1207_v41 = vpop.permute.xlu0 %1206 }
 0x6a8   : > { %v827_v33 = vld [vmem:[#allocation5] sm:$0xff] }
 0x6a9   : > { %v833_v5 = vmul.f32 %v831_v55, %v827_v33  ;;  %v888_v55 = vmul.f32 %v2145_v60, %v887_v17 }
 0x6ab   : > { %v838_v34 = vadd.f32 %v836_v7, %v833_v5 }
 0x6ad   : > { %840 = vst.msk [vmem:[#allocation5] sm:$0xff] %vm839_vm8, %v838_v34  ;;  %v1500_v34 = vld [vmem:[%s2242_s6 + $0x8] sm:$0xff] }
 0x6af   : > { %v1192_v49 = vpop.permute.xlu2 %1191 }
 0x6b4   : > { %v916_v36 = vld [vmem:[#allocation5] sm:$0xff] }
 0x6b5   : > { %v922_v37 = vmul.f32 %v920_v56, %v916_v36  ;;  %v1499_v36 = vld [vmem:[%s2242_s6] sm:$0xff] }
 0x6b7   : > { %v927_v13 = vadd.f32 %v925_v12, %v922_v37 }
 0x6b9   : > { %929 = vst.msk [vmem:[#allocation5] sm:$0xff] %vm928_vm9, %v927_v13 }
 0x6c0   : > { %v1005_v39 = vld [vmem:[#allocation5] sm:$0xff] }
 0x6c1   : > { %v1011_v40 = vmul.f32 %v1009_v29, %v1005_v39  ;;  %v1305_v29 = vsel %vm385_vm0, %v1499_v36, 0 }
 0x6c3   : > { %v1016_v24 = vadd.f32 %v1014_v35, %v1011_v40  ;;  %v1308_v35 = vsel %vm385_vm0, %v1500_v34, 0 }
 0x6c4   : > { %1316 = vmatpush.bf16.xpose.msrb.mxu1 %v1308_v35 }
 0x6c5   : > { %1018 = vst.msk [vmem:[#allocation5] sm:$0xff] %vm1017_vm10, %v1016_v24 }
 0x6cb   : > { %v802_v25 = vpop.xlane.xlu1 %801 }
 0x6cc   : > { %v1094_v46 = vld [vmem:[#allocation5] sm:$0xff]  ;;  %v803_v48 = vadd.f32 %v802_v25, %v799_v1  ;;  %1317 = vmatpush.bf16.xpose.msrb.mxu1 %v1305_v29 }
 0x6cd   : > { %v1100_v51 = vmul.f32 %v1098_v58, %v1094_v46  ;;  %v1586_v46 = vld [vmem:[%s2243_s7] ss:$0 sm:$0xff] }
 0x6ce   : > { %804 = vst.msk [vmem:[#allocation4 + $0x18] sm:$0xff] %vm412_vm3, %v803_v48 }
 0x6cf   : > { %v1105_v54 = vadd.f32 %v1103_v61, %v1100_v51 }
 0x6d1   : > { %1107 = vst.msk [vmem:[#allocation5] sm:$0xff] %vm1106_vm11, %v1105_v54 }
 0x6d2   : > { %v1158_v31 = vpop.xlane.xlu0 %1157 }
 0x6d3   : > { %v1159_v43 = vadd.f32 %v1158_v31, %v1155_v18  ;;  %v891_v21 = vpop.xlane.xlu1 %890 }
 0x6d4   : > { %v892_v57 = vadd.f32 %v891_v21, %v888_v55 }
 0x6d5   : > { %1160 = vst.msk [vmem:[#allocation4 + $0x38] sm:$0xff] %vm412_vm3, %v1159_v43  ;;  %v1231_v62 = vld [vmem:[#allocation4 + $0x18] sm:$0xff] }
 0x6d6   : > { %893 = vst.msk [vmem:[#allocation4 + $0x20] sm:$0xff] %vm412_vm3, %v892_v57  ;;  %1625 = vrcp.f32 %v1231_v62 }
 0x6d8   : > { %v1183_v0 = vld [vmem:[#allocation5] sm:$0xff] }
 0x6d9   : > { %v1189_v47 = vmul.f32 %v1187_v22, %v1183_v0 }
 0x6db   : > { %v1194_v15 = vadd.f32 %v1192_v49, %v1189_v47  ;;  %v980_v3 = vpop.xlane.xlu1 %979 }
 0x6dc   : > { %v1626_v6 = vpop.eup %1625  ;;  %v981_v60 = vadd.f32 %v980_v3, %v977_v2  ;;  %v1271_v8 = vld [vmem:[#allocation4 + $0x38] sm:$0xff] }
 0x6dd   : > { %1196 = vst.msk [vmem:[#allocation5] sm:$0xff] %vm1195_vm12, %v1194_v15  ;;  %1236 = vperm.xlu1 %1582, %v1626_v6   ;;  %v1241_v42 = vld [vmem:[#allocation4 + $0x20] sm:$0xff] }
 0x6de   : > { %982 = vst.msk [vmem:[#allocation4 + $0x28] sm:$0xff] %vm412_vm3, %v981_v60  ;;  %1627 = vrcp.f32 %v1241_v42 }
 0x6e4   : > { %v1628_v44 = vpop.eup %1627  ;;  %v1203_v45 = vld [vmem:[#allocation5] sm:$0xff] }
 0x6e5   : > { %1246 = vperm.xlu2 %1583, %v1628_v44   ;;  %v1251_v12 = vld [vmem:[#allocation4 + $0x28] sm:$0xff]  ;;  %v1209_v16 = vmul.f32 %v1207_v41, %v1203_v45 }
 0x6e6   : > { %1629 = vrcp.f32 %v1251_v12 }
 0x6e7   : > { %1210 = vst.msk [vmem:[#allocation5] sm:$0xff] %vm494_vm2, %v1209_v16  ;;  %1631 = vrcp.f32 %v1271_v8 }
 0x6ec   : > { %v1630_v19 = vpop.eup %1629 }
 0x6ed   : > { %1256 = vperm.xlu1 %1582, %v1630_v19   ;;  %v1632_v4 = vpop.eup %1631 }
 0x6ee   : > { %v1213_v11 = vld [vmem:[#allocation5] sm:$0xff] }
 0x6f1   : > { %v1069_v59 = vpop.xlane.xlu2 %1068 }
 0x6f2   : > { %v1070_v10 = vadd.f32 %v1069_v59, %v1066_v38 }
 0x6f3   : > { %v1217_v50 = vpop.permute.xlu1 %1216 }
 0x6f4   : > { %1071 = vst.msk [vmem:[#allocation4 + $0x30] sm:$0xff] %vm412_vm3, %v1070_v10  ;;  %v1219_v14 = vmul.f32 %v1217_v50, %v1213_v11 }
 0x6f5   : > { %1276 = vperm.xlu1 %1582, %v1632_v4  }
 0x6f6   : > { %1220 = vst.msk [vmem:[#allocation5] sm:$0xff] %vm661_vm6, %v1219_v14 }
 0x6fb   : > { %v1261_v23 = vld [vmem:[#allocation4 + $0x30] sm:$0xff] }
 0x6fc   : > { %v1227_v27 = vpop.permute.xlu1 %1226  ;;  %1633 = vrcp.f32 %v1261_v23 }
 0x6fd   : > { %v1223_v9 = vld [vmem:[#allocation5] sm:$0xff] }
 0x6fe   : > { %v1229_v28 = vmul.f32 %v1227_v27, %v1223_v9 }
 0x700   : > { %1230 = vst.msk [vmem:[#allocation5] sm:$0xff] %vm750_vm7, %v1229_v28 }
 0x702   : > { %v1634_v30 = vpop.eup %1633 }
 0x703   : > { %1266 = vperm.xlu0 %1581, %v1634_v30  }
 0x707   : > { %v1233_v32 = vld [vmem:[#allocation5] sm:$0xff] }
 0x73f   : > { %v1247_v33 = vpop.permute.xlu2 %1246 }
 0x74f   : > { %v1237_v53 = vpop.permute.xlu1 %1236 }
 0x750   : > { %v1239_v56 = vmul.f32 %v1237_v53, %v1233_v32 }
 0x752   : > { %1240 = vst.msk [vmem:[#allocation5] sm:$0xff] %vm839_vm8, %v1239_v56 }
 0x759   : > { %v1243_v5 = vld [vmem:[#allocation5] sm:$0xff] }
 0x75a   : > { %v1249_v7 = vmul.f32 %v1247_v33, %v1243_v5 }
 0x75c   : > { %1250 = vst.msk [vmem:[#allocation5] sm:$0xff] %vm928_vm9, %v1249_v7 }
 0x75f   : > { %v1257_v37 = vpop.permute.xlu1 %1256 }
 0x763   : > { %v1253_v13 = vld [vmem:[#allocation5] sm:$0xff] }
 0x764   : > { %v1259_v58 = vmul.f32 %v1257_v37, %v1253_v13 }
 0x766   : > { %1260 = vst.msk [vmem:[#allocation5] sm:$0xff] %vm1017_vm10, %v1259_v58 }
 0x767   : > { %v1277_v24 = vpop.permute.xlu1 %1276 }
 0x76d   : > { %v1263_v39 = vld [vmem:[#allocation5] sm:$0xff] }
 0x775   : > { %v1267_v40 = vpop.permute.xlu0 %1266 }
 0x776   : > { %v1269_v22 = vmul.f32 %v1267_v40, %v1263_v39 }
 0x778   : > { %1270 = vst.msk [vmem:[#allocation5] sm:$0xff] %vm1106_vm11, %v1269_v22 }
 0x77f   : > { %v1273_v26 = vld [vmem:[#allocation5] sm:$0xff] }
 0x780   : > { %v1279_v41 = vmul.f32 %v1277_v24, %v1273_v26 }
 0x782   : > { %1280 = vst.msk [vmem:[#allocation5] sm:$0xff] %vm1195_vm12, %v1279_v41 }
 0x789   : > { %v1281_v1 = vld [vmem:[#allocation5] sm:$0xff] }
 0x78a   : > { %v1282_v25 = vpack.c.bf16 %v1281_v1, %v1281_v1 }
 0x78c   : > { %1488 = vmatmul.msk.bf16.vlgmr.msrb.gmra.mxu1 %vm385_vm0, %v1282_v25 }
 0x809   : > { %v1319_v48 = vpop.f32.mrf.mxu1 }
 0x80a   : > { %v1320_v51 = vadd.f32 %v1586_v46, %v1319_v48 }
 0x80c   : > { %1323 = vst.msk [vmem:[%s346_s16] sm:$0xff] %vm385_vm0, %v1320_v51 }
 0x80d   : > { %1662 = shalt.err (!%p1659_p5)
}
 0x80e   : > { %1501 = dma.vmem_to_hbm [thread:$0]  (%p1825_p4), %s1339_s19, 128, %s1341_s12, %s1325_s30  }
 0x811   : > { %v1321_v61 = vpop.f32.mrf.mxu1 }
 0x812 PF: > { %p1507_p6 = scmp.ge.s32.totalorder %s1713_s10, 2  ;;  %s1352_s21 = sand.u32 1, %s1693_s27  }
 0x813   : > { %s1353_s11 = scalar_lea.sflag [#allocation7], %s1352_s21 }
 0x814   : > { %p1504_p7 = pnand %p1507_p6, %p1832_p8 }
 0x816   : > { %p1505_p9 = pneg %p1504_p7 }
 0x818   : > { %1688 = dma.done.wait (%p1505_p9), %s1353_s11, 128  }
 0x819   : > { %1690 = vsyncadd (%p1505_p9), %s1353_s11, 4294967168  ;;  %s21_s10 = sadd.s32 1, %s1713_s10   ;;  %s2249_s27 = smov %s1697_s28 }
 0x81a   : > { %p18_p10 = scmp.ge.s32.totalorder %s21_s10, 4   ;;  %s2250_s28 = smov %s1701_s29 }
 0x81b   : > { %s2251_s29 = smov %s1838_s18  ;;  %s2252_s30 = smov %s1709_s9 }
 0x81c   : > { %s2253_s9 = smov %s2255_s13  ;;  %20 = sbr.rel (!%p18_p10) target bundleno = 6 (0x6), region = 112 }
 0x821   :  { %1359 = vsyncpa [#allocation7], 1 }
 0x822   :  { %1361 = vsyncpa [#allocation7 + $0x1], 1 }

</bundles_post_ra>
